<compile_context>
chip_gen: v5e
topology: v5e:2x2
jax: 0.10.0
libtpu: 0.0.40
codegen_flags: <defaults>
</compile_context>

<pallas_src>
from functools import partial

import jax
import jax.numpy as jnp
from jax import lax
from jax.experimental import pallas as pl
from jax.experimental.pallas import tpu as pltpu

EPS = 1e-5                       # nn.BatchNorm2d default eps
_VMEM_LIMIT = 48 * 1024 * 1024   # < v7x's 64 MiB physical, > 32 MiB scoped default


# ------------------------------ small helpers ------------------------------ #
def _params(semantics):
    return pltpu.CompilerParams(dimension_semantics=semantics,
                                vmem_limit_bytes=_VMEM_LIMIT)


def _cost(flops, nbytes, transc=0):
    return pl.CostEstimate(flops=int(flops), transcendentals=int(transc),
                           bytes_accessed=int(nbytes))


def _pick_row_tile(m, target):
    """Largest multiple of 16 dividing m that is <= target (else m itself)."""
    t = min(target, m)
    t -= t % 16
    while t >= 16:
        if m % t == 0:
            return t
        t -= 16
    return m


def _bn_scale_shift(sum_v, ssq_v, g_v, b_v, inv_m):
    mean = sum_v * inv_m
    var = ssq_v * inv_m - mean * mean          # f32 accumulators -> safe
    scale = g_v * lax.rsqrt(var + EPS)
    shift = b_v - mean * scale
    return scale, shift


# ------------------------- 1x1 conv (matmul) + BN --------------------------- #
def _mm_stats_kernel(x_ref, w_ref, sum_ref, ssq_ref):
    @pl.when(pl.program_id(0) == 0)
    def _init():
        sum_ref[...] = jnp.zeros_like(sum_ref)
        ssq_ref[...] = jnp.zeros_like(ssq_ref)

    y = jnp.dot(x_ref[...], w_ref[...], preferred_element_type=jnp.float32)
    sum_ref[...] += jnp.sum(y, axis=0, keepdims=True)
    ssq_ref[...] += jnp.sum(y * y, axis=0, keepdims=True)


def _make_mm_apply_kernel(inv_m, relu):
    def kernel(x_ref, w_ref, sum_ref, ssq_ref, g_ref, b_ref, o_ref):
        y = jnp.dot(x_ref[...], w_ref[...], preferred_element_type=jnp.float32)
        scale, shift = _bn_scale_shift(sum_ref[...], ssq_ref[...],
                                       g_ref[...], b_ref[...], inv_m)
        y = y * scale + shift
        if relu:
            y = jnp.maximum(y, 0.0)
        o_ref[...] = y.astype(o_ref.dtype)
    return kernel


def matmul_bn_relu(x2d, w, gamma, beta, *, relu, row_tile, out_dtype):
    """[relu](BN_batch(x2d @ w)) with a two-pass (stats, apply) row-tiled pipeline."""
    M, K = x2d.shape
    N = w.shape[1]
    tm = _pick_row_tile(M, row_tile)
    grid = (M // tm,)

    xb = x2d.astype(jnp.bfloat16)
    wb = w.astype(jnp.bfloat16)
    g = gamma.reshape(1, N).astype(jnp.float32)
    b = beta.reshape(1, N).astype(jnp.float32)

    x_spec = pl.BlockSpec((tm, K), lambda i: (i, 0))
    w_spec = pl.BlockSpec((K, N), lambda i: (0, 0))
    vec = pl.BlockSpec((1, N), lambda i: (0, 0))

    flops = 2 * M * K * N
    in_bytes = 2 * (M * K + K * N)

    sums, ssqs = pl.pallas_call(
        _mm_stats_kernel,
        grid=grid,
        in_specs=[x_spec, w_spec],
        out_specs=[vec, vec],
        out_shape=[jax.ShapeDtypeStruct((1, N), jnp.float32)] * 2,
        compiler_params=_params(("arbitrary",)),
        cost_estimate=_cost(flops, in_bytes + 8 * N),
    )(xb, wb)

    out = pl.pallas_call(
        _make_mm_apply_kernel(1.0 / M, relu),
        grid=grid,
        in_specs=[x_spec, w_spec, vec, vec, vec, vec],
        out_specs=pl.BlockSpec((tm, N), lambda i: (i, 0)),
        out_shape=jax.ShapeDtypeStruct((M, N), out_dtype),
        compiler_params=_params(("parallel",)),
        cost_estimate=_cost(flops, in_bytes + M * N * jnp.dtype(out_dtype).itemsize, N),
    )(xb, wb, sums, ssqs, g, b)
    return out


# -------------------- 3x3 conv (stride, pad=1) + BN + ReLU ------------------ #
def _conv2_taps(s):
    """Static (phase, row_off, col_off, tap_index) tuples for the 3x3 taps."""
    taps = []
    for ky in range(3):
        for kx in range(3):
            taps.append(((ky % s) * s + (kx % s), ky // s, kx // s, ky * 3 + kx))
    return taps


def _make_conv2_stats_kernel(s, Ho, Wo, C, Cout):
    taps = _conv2_taps(s)

    def kernel(z_ref, w_ref, sum_ref, ssq_ref):
        @pl.when(pl.program_id(0) == 0)
        def _init():
            sum_ref[...] = jnp.zeros_like(sum_ref)
            ssq_ref[...] = jnp.zeros_like(ssq_ref)

        w_taps = [w_ref[t] for _, _, _, t in taps]           # (C, Cout) each

        def row_body(oh, carry):
            s_acc, q_acc = carry
            row = jnp.zeros((Wo, Cout), jnp.float32)
            for (ph, r0, c0, _), wt in zip(taps, w_taps):
                v = z_ref[ph, r0 + oh, pl.ds(c0, Wo), :]      # (Wo, C) bf16, contiguous
                row += jnp.dot(v, wt, preferred_element_type=jnp.float32)
            s_acc += jnp.sum(row, axis=0, keepdims=True)
            q_acc += jnp.sum(row * row, axis=0, keepdims=True)
            return s_acc, q_acc

        zero = jnp.zeros((1, Cout), jnp.float32)
        s_acc, q_acc = lax.fori_loop(0, Ho, row_body, (zero, zero))
        sum_ref[...] += s_acc
        ssq_ref[...] += q_acc

    return kernel


def _make_conv2_apply_kernel(s, Ho, Wo, C, Cout, inv_m):
    taps = _conv2_taps(s)

    def kernel(z_ref, w_ref, sum_ref, ssq_ref, g_ref, b_ref, o_ref):
        scale, shift = _bn_scale_shift(sum_ref[...], ssq_ref[...],
                                       g_ref[...], b_ref[...], inv_m)
        w_taps = [w_ref[t] for _, _, _, t in taps]

        def row_body(oh, carry):
            row = jnp.zeros((Wo, Cout), jnp.float32)
            for (ph, r0, c0, _), wt in zip(taps, w_taps):
                v = z_ref[ph, r0 + oh, pl.ds(c0, Wo), :]
                row += jnp.dot(v, wt, preferred_element_type=jnp.float32)
            row = jnp.maximum(row * scale + shift, 0.0)
            start = oh * Wo
            if Wo % 8 == 0:
                start = pl.multiple_of(start, 8)
            o_ref[pl.ds(start, Wo), :] = row.astype(o_ref.dtype)
            return carry

        lax.fori_loop(0, Ho, row_body, 0)

    return kernel


def conv2_bn_relu(y1_nhwc, w_hwio, gamma, beta, *, stride, out_dtype=jnp.bfloat16):
    """relu(BN_batch(conv3x3(y1, stride, pad=1))) without an HBM im2col."""
    N, H, W, C = y1_nhwc.shape
    Cout = w_hwio.shape[-1]
    s = stride
    Hp, Wp = H + 2, W + 2
    assert Hp % s == 0 and Wp % s == 0, "spatial size must be divisible by stride"
    Ho = (Hp - 3) // s + 1
    Wo = (Wp - 3) // s + 1
    Hq, Wq = Hp // s, Wp // s
    assert (Ho * Wo) % 16 == 0 or N == 1, "per-image output block must be sublane aligned"

    # Pad once; for stride>1 do a single space-to-depth phase repack so every
    # 3x3 tap becomes a *contiguous* window (no 9x HBM im2col, no strided loads
    # inside the kernel).
    xp = jnp.pad(y1_nhwc.astype(jnp.bfloat16), ((0, 0), (1, 1), (1, 1), (0, 0)))
    if s == 1:
        z = xp
    else:
        z = xp.reshape(N, Hq, s, Wq, s, C).transpose(0, 2, 4, 1, 3, 5)
    z = z.reshape(N * s * s, Hq, Wq, C)

    w = w_hwio.reshape(9, C, Cout).astype(jnp.bfloat16)
    g = gamma.reshape(1, Cout).astype(jnp.float32)
    b = beta.reshape(1, Cout).astype(jnp.float32)

    z_spec = pl.BlockSpec((s * s, Hq, Wq, C), lambda n: (n, 0, 0, 0))
    w_spec = pl.BlockSpec((9, C, Cout), lambda n: (0, 0, 0))
    vec = pl.BlockSpec((1, Cout), lambda n: (0, 0))
    grid = (N,)
    M = N * Ho * Wo
    flops = 2 * M * 9 * C * Cout
    in_bytes = 2 * (z.size + w.size)

    sums, ssqs = pl.pallas_call(
        _make_conv2_stats_kernel(s, Ho, Wo, C, Cout),
        grid=grid,
        in_specs=[z_spec, w_spec],
        out_specs=[vec, vec],
        out_shape=[jax.ShapeDtypeStruct((1, Cout), jnp.float32)] * 2,
        compiler_params=_params(("arbitrary",)),
        cost_estimate=_cost(flops, in_bytes + 8 * Cout),
    )(z, w)

    y2 = pl.pallas_call(
        _make_conv2_apply_kernel(s, Ho, Wo, C, Cout, 1.0 / M),
        grid=grid,
        in_specs=[z_spec, w_spec, vec, vec, vec, vec],
        out_specs=pl.BlockSpec((Ho * Wo, Cout), lambda n: (n, 0)),
        out_shape=jax.ShapeDtypeStruct((M, Cout), out_dtype),
        compiler_params=_params(("parallel",)),
        cost_estimate=_cost(flops, in_bytes + M * Cout * 2, Cout),
    )(z, w, sums, ssqs, g, b)
    return y2, Ho, Wo


# ------------- conv3 (1x1) + BN3 + [shortcut conv + BNs] + add + relu ------- #
def _proj_stats_kernel(x_ref, xs_ref, w3_ref, ws_ref, s3_ref, q3_ref, ss_ref, qs_ref):
    @pl.when(pl.program_id(0) == 0)
    def _init():
        for r in (s3_ref, q3_ref, ss_ref, qs_ref):
            r[...] = jnp.zeros_like(r)

    y3 = jnp.dot(x_ref[...], w3_ref[...], preferred_element_type=jnp.float32)
    sc = jnp.dot(xs_ref[...], ws_ref[...], preferred_element_type=jnp.float32)
    s3_ref[...] += jnp.sum(y3, axis=0, keepdims=True)
    q3_ref[...] += jnp.sum(y3 * y3, axis=0, keepdims=True)
    ss_ref[...] += jnp.sum(sc, axis=0, keepdims=True)
    qs_ref[...] += jnp.sum(sc * sc, axis=0, keepdims=True)


def _make_proj_apply_kernel(inv_m):
    def kernel(x_ref, xs_ref, w3_ref, ws_ref, s3_ref, q3_ref, ss_ref, qs_ref,
               g3_ref, b3_ref, gs_ref, bs_ref, o_ref):
        y3 = jnp.dot(x_ref[...], w3_ref[...], preferred_element_type=jnp.float32)
        sc = jnp.dot(xs_ref[...], ws_ref[...], preferred_element_type=jnp.float32)
        a3, c3 = _bn_scale_shift(s3_ref[...], q3_ref[...], g3_ref[...], b3_ref[...], inv_m)
        as_, cs_ = _bn_scale_shift(ss_ref[...], qs_ref[...], gs_ref[...], bs_ref[...], inv_m)
        out = (y3 * a3 + c3) + (sc * as_ + cs_)
        o_ref[...] = jnp.maximum(out, 0.0).astype(o_ref.dtype)
    return kernel


def _make_id_apply_kernel(inv_m):
    def kernel(x_ref, res_ref, w3_ref, s3_ref, q3_ref, g3_ref, b3_ref, o_ref):
        y3 = jnp.dot(x_ref[...], w3_ref[...], preferred_element_type=jnp.float32)
        a3, c3 = _bn_scale_shift(s3_ref[...], q3_ref[...], g3_ref[...], b3_ref[...], inv_m)
        out = (y3 * a3 + c3) + res_ref[...].astype(jnp.float32)
        o_ref[...] = jnp.maximum(out, 0.0).astype(o_ref.dtype)
    return kernel


def conv3_add_shortcut(y2_2d, res_2d, p, *, proj, row_tile, out_dtype=jnp.float32):
    """relu(BN3(y2 @ w3) + (proj ? BNs(res @ ws) : res)), fused, two-pass tiled."""
    M, K3 = y2_2d.shape
    N = p["w3"].shape[1]
    tm = _pick_row_tile(M, row_tile)
    grid = (M // tm,)

    xb = y2_2d.astype(jnp.bfloat16)
    w3 = p["w3"].astype(jnp.bfloat16)
    g3 = p["g3"].reshape(1, N).astype(jnp.float32)
    b3 = p["b3"].reshape(1, N).astype(jnp.float32)

    x_spec = pl.BlockSpec((tm, K3), lambda i: (i, 0))
    w3_spec = pl.BlockSpec((K3, N), lambda i: (0, 0))
    vec = pl.BlockSpec((1, N), lambda i: (0, 0))
    o_spec = pl.BlockSpec((tm, N), lambda i: (i, 0))

    if proj:
        Ks = res_2d.shape[1]
        xs = res_2d.astype(jnp.bfloat16)
        ws = p["ws"].astype(jnp.bfloat16)
        gs = p["gs"].reshape(1, N).astype(jnp.float32)
        bs = p["bs"].reshape(1, N).astype(jnp.float32)
        xs_spec = pl.BlockSpec((tm, Ks), lambda i: (i, 0))
        ws_spec = pl.BlockSpec((Ks, N), lambda i: (0, 0))
        flops = 2 * M * (K3 + Ks) * N
        in_bytes = 2 * (M * K3 + M * Ks + K3 * N + Ks * N)

        stats = pl.pallas_call(
            _proj_stats_kernel,
            grid=grid,
            in_specs=[x_spec, xs_spec, w3_spec, ws_spec],
            out_specs=[vec] * 4,
            out_shape=[jax.ShapeDtypeStruct((1, N), jnp.float32)] * 4,
            compiler_params=_params(("arbitrary",)),
            cost_estimate=_cost(flops, in_bytes + 16 * N),
        )(xb, xs, w3, ws)

        out = pl.pallas_call(
            _make_proj_apply_kernel(1.0 / M),
            grid=grid,
            in_specs=[x_spec, xs_spec, w3_spec, ws_spec] + [vec] * 8,
            out_specs=o_spec,
            out_shape=jax.ShapeDtypeStruct((M, N), out_dtype),
            compiler_params=_params(("parallel",)),
            cost_estimate=_cost(flops, in_bytes + M * N * 4, 2 * N),
        )(xb, xs, w3, ws, *stats, g3, b3, gs, bs)
    else:
        res = res_2d.astype(jnp.bfloat16)
        res_spec = pl.BlockSpec((tm, N), lambda i: (i, 0))
        flops = 2 * M * K3 * N
        in_bytes = 2 * (M * K3 + K3 * N + M * N)

        stats = pl.pallas_call(
            _mm_stats_kernel,
            grid=grid,
            in_specs=[x_spec, w3_spec],
            out_specs=[vec, vec],
            out_shape=[jax.ShapeDtypeStruct((1, N), jnp.float32)] * 2,
            compiler_params=_params(("arbitrary",)),
            cost_estimate=_cost(flops, 2 * (M * K3 + K3 * N) + 8 * N),
        )(xb, w3)

        out = pl.pallas_call(
            _make_id_apply_kernel(1.0 / M),
            grid=grid,
            in_specs=[x_spec, res_spec, w3_spec, vec, vec, vec, vec],
            out_specs=o_spec,
            out_shape=jax.ShapeDtypeStruct((M, N), out_dtype),
            compiler_params=_params(("parallel",)),
            cost_estimate=_cost(flops, in_bytes + M * N * 4, N),
        )(xb, res, w3, *stats, g3, b3)
    return out


# ------------------------------ Bottleneck glue ----------------------------- #
def bottleneck_forward(x_nchw, p, stride, planes, *, row_tile=1024):
    """Pallas implementation of Bottleneck.forward (training-mode BatchNorm)."""
    x = jnp.transpose(x_nchw, (0, 2, 3, 1))              # NCHW -> NHWC
    N, H, W, Cin = x.shape
    exp = 4 * planes
    xb = x.astype(jnp.bfloat16)

    # conv1 (1x1) + bn1 + relu
    y1 = matmul_bn_relu(xb.reshape(N * H * W, Cin), p["w1"], p["g1"], p["b1"],
                        relu=True, row_tile=row_tile, out_dtype=jnp.bfloat16)
    y1 = y1.reshape(N, H, W, planes)

    # conv2 (3x3, stride, pad=1) + bn2 + relu
    y2_2d, Ho, Wo = conv2_bn_relu(y1, p["w2"], p["g2"], p["b2"], stride=stride)

    # conv3 (1x1) + bn3 + shortcut(+BN) + add + relu, fused
    proj = (stride != 1) or (Cin != exp)
    if proj:
        res_2d = xb[:, ::stride, ::stride, :].reshape(N * Ho * Wo, Cin)
    else:
        res_2d = xb.reshape(N * H * W, Cin)
    out2d = conv3_add_shortcut(y2_2d, res_2d, p, proj=proj,
                               row_tile=row_tile, out_dtype=jnp.float32)
    out = out2d.reshape(N, Ho, Wo, exp)
    return jnp.transpose(out, (0, 3, 1, 2))              # back to NCHW


# ---------------------- pure-JAX precision-matched reference ---------------- #
def _bn_ref(y, gamma, beta):
    mean = jnp.mean(y, axis=(0, 1, 2), keepdims=True)
    var = jnp.mean(jnp.square(y - mean), axis=(0, 1, 2), keepdims=True)
    return (y - mean) * lax.rsqrt(var + EPS) * gamma + beta


def reference_forward(x_nchw, p, stride, planes):
    x = jnp.transpose(x_nchw, (0, 2, 3, 1)).astype(jnp.float32)
    dn = ("NHWC", "HWIO", "NHWC")
    conv = partial(lax.conv_general_dilated, dimension_numbers=dn,
                   preferred_element_type=jnp.float32)
    bf = jnp.bfloat16
    exp = 4 * planes

    w1 = p["w1"].reshape(1, 1, *p["w1"].shape).astype(bf)
    y1 = jax.nn.relu(_bn_ref(conv(x.astype(bf), w1, (1, 1), "VALID"), p["g1"], p["b1"]))
    y2 = jax.nn.relu(_bn_ref(conv(y1.astype(bf), p["w2"].astype(bf),
                                  (stride, stride), ((1, 1), (1, 1))),
                             p["g2"], p["b2"]))
    w3 = p["w3"].reshape(1, 1, *p["w3"].shape).astype(bf)
    y3 = _bn_ref(conv(y2.astype(bf), w3, (1, 1), "VALID"), p["g3"], p["b3"])
    if stride != 1 or x.shape[-1] != exp:
        ws = p["ws"].reshape(1, 1, *p["ws"].shape).astype(bf)
        sc = _bn_ref(conv(x.astype(bf), ws, (stride, stride), "VALID"), p["gs"], p["bs"])
    else:
        sc = x
    out = jax.nn.relu(y3 + sc)
    return jnp.transpose(out, (0, 3, 1, 2))


# ---------------------------------- main ------------------------------------ #
if __name__ == "__main__":
    key = jax.random.PRNGKey(0)
    ks = jax.random.split(key, 10)

    # Bottleneck(in_planes=4, planes=4, stride=2) at small shapes.
    in_planes, planes, stride = 4, 4, 2
    exp = 4 * planes
    N, H, W = 2, 16, 16

    x = jax.random.normal(ks[0], (N, in_planes, H, W), jnp.float32)

    params = {
        "w1": 0.1 * jax.random.normal(ks[1], (in_planes, planes), jnp.float32),
        "g1": 1.0 + 0.1 * jax.random.normal(ks[5], (planes,), jnp.float32),
        "b1": 0.1 * jax.random.normal(ks[6], (planes,), jnp.float32),
        "w2": 0.1 * jax.random.normal(ks[2], (3, 3, planes, planes), jnp.float32),
        "g2": jnp.ones((planes,), jnp.float32),
        "b2": jnp.zeros((planes,), jnp.float32),
        "w3": 0.1 * jax.random.normal(ks[3], (planes, exp), jnp.float32),
        "g3": 1.0 + 0.1 * jax.random.normal(ks[7], (exp,), jnp.float32),
        "b3": 0.1 * jax.random.normal(ks[8], (exp,), jnp.float32),
        "ws": 0.1 * jax.random.normal(ks[4], (in_planes, exp), jnp.float32),
        "gs": jnp.ones((exp,), jnp.float32),
        "bs": jnp.zeros((exp,), jnp.float32),
    }

    # Small row_tile so the toy shapes actually exercise multi-tile grids and
    # the cross-tile BN-stat accumulation; use the default (1024) at real sizes.
    fwd = jax.jit(partial(bottleneck_forward, stride=stride, planes=planes,
                          row_tile=64))
    out = fwd(x, params)
    jax.block_until_ready(out)

    ref = reference_forward(x, params, stride, planes)
    err = float(jnp.max(jnp.abs(out - ref)))
    assert out.shape == (N, exp, H // stride, W // stride), out.shape
    # bf16 matmul operands -> compare against a precision-matched reference
    # with a bf16-appropriate tolerance.
    assert err < 3e-2, f"max abs err {err}"

    print("KERNEL_OK")
</pallas_src>

<mosaic_0001>
module attributes {stable_mosaic.version = 11 : i64} {
  func.func @_mm_stats_kernel(%arg0: i32, %arg1: memref<64x4xbf16, #tpu.memory_space<vmem>>, %arg2: memref<4x4xbf16, #tpu.memory_space<vmem>>, %arg3: memref<1x4xf32, #tpu.memory_space<vmem>>, %arg4: memref<1x4xf32, #tpu.memory_space<vmem>>) attributes {dimension_semantics = [#tpu.dimension_semantics<arbitrary>], iteration_bounds = array<i64: 8>, scalar_prefetch = 0 : i64, scratch_operands = 0 : i64, tpu.core_type = #tpu.core_type<tc>, window_params = [{transform_indices = @transform_0, window_bounds = array<i64: 64, 4>}, {pipeline_mode = #tpu.pipeline_mode<synchronous>, transform_indices = @transform_1, window_bounds = array<i64: 4, 4>}, {pipeline_mode = #tpu.pipeline_mode<synchronous>, transform_indices = @transform_2, window_bounds = array<i64: 1, 4>}, {pipeline_mode = #tpu.pipeline_mode<synchronous>, transform_indices = @transform_3, window_bounds = array<i64: 1, 4>}]} {
    %c0_i32 = arith.constant 0 : i32
    %0 = arith.cmpi eq, %arg0, %c0_i32 : i32
    %1 = arith.extui %0 : i1 to i32
    %c0_i32_0 = arith.constant 0 : i32
    %2 = arith.cmpi ne, %1, %c0_i32_0 : i32
    scf.if %2 {
      %cst_14 = arith.constant 0.000000e+00 : f32
      %17 = vector.broadcast %cst_14 : f32 to vector<1x4xf32>
      %c0_15 = arith.constant 0 : index
      %c0_16 = arith.constant 0 : index
      %18 = vector.load %arg3[%c0_15, %c0_16] : memref<1x4xf32, #tpu.memory_space<vmem>>, vector<1x4xf32>
      tpu.vector_store %arg3[%c0_15, %c0_16], %17 {strides = array<i32>} : memref<1x4xf32, #tpu.memory_space<vmem>>, vector<1x4xf32>,
      %cst_17 = arith.constant 0.000000e+00 : f32
      %19 = vector.broadcast %cst_17 : f32 to vector<1x4xf32>
      %c0_18 = arith.constant 0 : index
      %c0_19 = arith.constant 0 : index
      %20 = vector.load %arg4[%c0_18, %c0_19] : memref<1x4xf32, #tpu.memory_space<vmem>>, vector<1x4xf32>
      tpu.vector_store %arg4[%c0_18, %c0_19], %19 {strides = array<i32>} : memref<1x4xf32, #tpu.memory_space<vmem>>, vector<1x4xf32>,
    } else {
    }
    %c0 = arith.constant 0 : index
    %c0_1 = arith.constant 0 : index
    %3 = vector.load %arg1[%c0, %c0_1] : memref<64x4xbf16, #tpu.memory_space<vmem>>, vector<64x4xbf16>
    %c0_2 = arith.constant 0 : index
    %c0_3 = arith.constant 0 : index
    %4 = vector.load %arg2[%c0_2, %c0_3] : memref<4x4xbf16, #tpu.memory_space<vmem>>, vector<4x4xbf16>
    %cst = arith.constant dense<0.000000e+00> : vector<64x4xf32>
    %5 = tpu.matmul %3, %4, %cst {dimension_numbers = #tpu.dot_dimension_numbers<[1], [0], [0], [1], [0, 0, 1, 1], [], []>} : vector<64x4xbf16>, vector<4x4xbf16>, vector<64x4xf32> -> vector<64x4xf32>
    %c0_4 = arith.constant 0 : index
    %c0_5 = arith.constant 0 : index
    %6 = vector.load %arg3[%c0_4, %c0_5] : memref<1x4xf32, #tpu.memory_space<vmem>>, vector<1x4xf32>
    %cst_6 = arith.constant dense<0.000000e+00> : vector<4xf32>
    %7 = vector.multi_reduction <add>, %5, %cst_6 [0] : vector<64x4xf32> to vector<4xf32>
    %8 = vector.shape_cast %7 : vector<4xf32> to vector<1x4xf32>
    %9 = arith.addf %6, %8 : vector<1x4xf32>
    %c0_7 = arith.constant 0 : index
    %c0_8 = arith.constant 0 : index
    %10 = vector.load %arg3[%c0_7, %c0_8] : memref<1x4xf32, #tpu.memory_space<vmem>>, vector<1x4xf32>
    tpu.vector_store %arg3[%c0_7, %c0_8], %9 {strides = array<i32>} : memref<1x4xf32, #tpu.memory_space<vmem>>, vector<1x4xf32>,
    %c0_9 = arith.constant 0 : index
    %c0_10 = arith.constant 0 : index
    %11 = vector.load %arg4[%c0_9, %c0_10] : memref<1x4xf32, #tpu.memory_space<vmem>>, vector<1x4xf32>
    %12 = arith.mulf %5, %5 : vector<64x4xf32>
    %cst_11 = arith.constant dense<0.000000e+00> : vector<4xf32>
    %13 = vector.multi_reduction <add>, %12, %cst_11 [0] : vector<64x4xf32> to vector<4xf32>
    %14 = vector.shape_cast %13 : vector<4xf32> to vector<1x4xf32>
    %15 = arith.addf %11, %14 : vector<1x4xf32>
    %c0_12 = arith.constant 0 : index
    %c0_13 = arith.constant 0 : index
    %16 = vector.load %arg4[%c0_12, %c0_13] : memref<1x4xf32, #tpu.memory_space<vmem>>, vector<1x4xf32>
    tpu.vector_store %arg4[%c0_12, %c0_13], %15 {strides = array<i32>} : memref<1x4xf32, #tpu.memory_space<vmem>>, vector<1x4xf32>,
    return
  }
  func.func @transform_0(%arg0: i32) -> (i32, i32) {
    %c0_i32 = arith.constant 0 : i32
    %c0_i32_0 = arith.constant 0 : i32
    return %arg0, %c0_i32 : i32, i32
  }
  func.func @transform_1(%arg0: i32) -> (i32, i32) {
    %c0_i32 = arith.constant 0 : i32
    %c0_i32_0 = arith.constant 0 : i32
    %c0_i32_1 = arith.constant 0 : i32
    return %c0_i32, %c0_i32_0 : i32, i32
  }
  func.func @transform_2(%arg0: i32) -> (i32, i32) {
    %c0_i32 = arith.constant 0 : i32
    %c0_i32_0 = arith.constant 0 : i32
    %c0_i32_1 = arith.constant 0 : i32
    return %c0_i32, %c0_i32_0 : i32, i32
  }
  func.func @transform_3(%arg0: i32) -> (i32, i32) {
    %c0_i32 = arith.constant 0 : i32
    %c0_i32_0 = arith.constant 0 : i32
    %c0_i32_1 = arith.constant 0 : i32
    return %c0_i32, %c0_i32_0 : i32, i32
  }
}

module attributes {stable_mosaic.version = 11 : i64} {
  func.func @kernel(%arg0: i32, %arg1: memref<64x4xbf16, #tpu.memory_space<vmem>>, %arg2: memref<4x4xbf16, #tpu.memory_space<vmem>>, %arg3: memref<1x4xf32, #tpu.memory_space<vmem>>, %arg4: memref<1x4xf32, #tpu.memory_space<vmem>>, %arg5: memref<1x4xf32, #tpu.memory_space<vmem>>, %arg6: memref<1x4xf32, #tpu.memory_space<vmem>>, %arg7: memref<64x4xbf16, #tpu.memory_space<vmem>>) attributes {dimension_semantics = [#tpu.dimension_semantics<parallel>], iteration_bounds = array<i64: 8>, scalar_prefetch = 0 : i64, scratch_operands = 0 : i64, tpu.core_type = #tpu.core_type<tc>, window_params = [{transform_indices = @transform_0, window_bounds = array<i64: 64, 4>}, {pipeline_mode = #tpu.pipeline_mode<synchronous>, transform_indices = @transform_1, window_bounds = array<i64: 4, 4>}, {pipeline_mode = #tpu.pipeline_mode<synchronous>, transform_indices = @transform_2, window_bounds = array<i64: 1, 4>}, {pipeline_mode = #tpu.pipeline_mode<synchronous>, transform_indices = @transform_3, window_bounds = array<i64: 1, 4>}, {pipeline_mode = #tpu.pipeline_mode<synchronous>, transform_indices = @transform_4, window_bounds = array<i64: 1, 4>}, {pipeline_mode = #tpu.pipeline_mode<synchronous>, transform_indices = @transform_5, window_bounds = array<i64: 1, 4>}, {transform_indices = @transform_6, window_bounds = array<i64: 64, 4>}]} {
    %c0 = arith.constant 0 : index
    %c0_0 = arith.constant 0 : index
    %0 = vector.load %arg1[%c0, %c0_0] : memref<64x4xbf16, #tpu.memory_space<vmem>>, vector<64x4xbf16>
    %c0_1 = arith.constant 0 : index
    %c0_2 = arith.constant 0 : index
    %1 = vector.load %arg2[%c0_1, %c0_2] : memref<4x4xbf16, #tpu.memory_space<vmem>>, vector<4x4xbf16>
    %cst = arith.constant dense<0.000000e+00> : vector<64x4xf32>
    %2 = tpu.matmul %0, %1, %cst {dimension_numbers = #tpu.dot_dimension_numbers<[1], [0], [0], [1], [0, 0, 1, 1], [], []>} : vector<64x4xbf16>, vector<4x4xbf16>, vector<64x4xf32> -> vector<64x4xf32>
    %c0_3 = arith.constant 0 : index
    %c0_4 = arith.constant 0 : index
    %3 = vector.load %arg3[%c0_3, %c0_4] : memref<1x4xf32, #tpu.memory_space<vmem>>, vector<1x4xf32>
    %c0_5 = arith.constant 0 : index
    %c0_6 = arith.constant 0 : index
    %4 = vector.load %arg4[%c0_5, %c0_6] : memref<1x4xf32, #tpu.memory_space<vmem>>, vector<1x4xf32>
    %c0_7 = arith.constant 0 : index
    %c0_8 = arith.constant 0 : index
    %5 = vector.load %arg5[%c0_7, %c0_8] : memref<1x4xf32, #tpu.memory_space<vmem>>, vector<1x4xf32>
    %c0_9 = arith.constant 0 : index
    %c0_10 = arith.constant 0 : index
    %6 = vector.load %arg6[%c0_9, %c0_10] : memref<1x4xf32, #tpu.memory_space<vmem>>, vector<1x4xf32>
    %cst_11 = arith.constant 0.001953125 : f32
    %7 = vector.broadcast %cst_11 : f32 to vector<1x4xf32>
    %8 = arith.mulf %3, %7 : vector<1x4xf32>
    %cst_12 = arith.constant 0.001953125 : f32
    %9 = vector.broadcast %cst_12 : f32 to vector<1x4xf32>
    %10 = arith.mulf %4, %9 : vector<1x4xf32>
    %11 = arith.mulf %8, %8 : vector<1x4xf32>
    %12 = arith.subf %10, %11 : vector<1x4xf32>
    %cst_13 = arith.constant 9.99999974E-6 : f32
    %13 = vector.broadcast %cst_13 : f32 to vector<1x4xf32>
    %14 = arith.addf %12, %13 : vector<1x4xf32>
    %15 = math.rsqrt %14 : vector<1x4xf32>
    %16 = arith.mulf %5, %15 : vector<1x4xf32>
    %17 = arith.mulf %8, %16 : vector<1x4xf32>
    %18 = arith.subf %6, %17 : vector<1x4xf32>
    %19 = vector.broadcast %16 : vector<1x4xf32> to vector<64x4xf32>
    %20 = arith.mulf %2, %19 : vector<64x4xf32>
    %21 = vector.broadcast %18 : vector<1x4xf32> to vector<64x4xf32>
    %22 = arith.addf %20, %21 : vector<64x4xf32>
    %cst_14 = arith.constant 0.000000e+00 : f32
    %23 = vector.broadcast %cst_14 : f32 to vector<64x4xf32>
    %24 = arith.maximumf %22, %23 : vector<64x4xf32>
    %25 = arith.truncf %24 : vector<64x4xf32> to vector<64x4xbf16>
    %c0_15 = arith.constant 0 : index
    %c0_16 = arith.constant 0 : index
    %26 = vector.load %arg7[%c0_15, %c0_16] : memref<64x4xbf16, #tpu.memory_space<vmem>>, vector<64x4xbf16>
    tpu.vector_store %arg7[%c0_15, %c0_16], %25 {strides = array<i32>} : memref<64x4xbf16, #tpu.memory_space<vmem>>, vector<64x4xbf16>,
    return
  }
  func.func @transform_0(%arg0: i32) -> (i32, i32) {
    %c0_i32 = arith.constant 0 : i32
    %c0_i32_0 = arith.constant 0 : i32
    return %arg0, %c0_i32 : i32, i32
  }
  func.func @transform_1(%arg0: i32) -> (i32, i32) {
    %c0_i32 = arith.constant 0 : i32
    %c0_i32_0 = arith.constant 0 : i32
    %c0_i32_1 = arith.constant 0 : i32
    return %c0_i32, %c0_i32_0 : i32, i32
  }
  func.func @transform_2(%arg0: i32) -> (i32, i32) {
    %c0_i32 = arith.constant 0 : i32
    %c0_i32_0 = arith.constant 0 : i32
    %c0_i32_1 = arith.constant 0 : i32
    return %c0_i32, %c0_i32_0 : i32, i32
  }
  func.func @transform_3(%arg0: i32) -> (i32, i32) {
    %c0_i32 = arith.constant 0 : i32
    %c0_i32_0 = arith.constant 0 : i32
    %c0_i32_1 = arith.constant 0 : i32
    return %c0_i32, %c0_i32_0 : i32, i32
  }
  func.func @transform_4(%arg0: i32) -> (i32, i32) {
    %c0_i32 = arith.constant 0 : i32
    %c0_i32_0 = arith.constant 0 : i32
    %c0_i32_1 = arith.constant 0 : i32
    return %c0_i32, %c0_i32_0 : i32, i32
  }
  func.func @transform_5(%arg0: i32) -> (i32, i32) {
    %c0_i32 = arith.constant 0 : i32
    %c0_i32_0 = arith.constant 0 : i32
    %c0_i32_1 = arith.constant 0 : i32
    return %c0_i32, %c0_i32_0 : i32, i32
  }
  func.func @transform_6(%arg0: i32) -> (i32, i32) {
    %c0_i32 = arith.constant 0 : i32
    %c0_i32_0 = arith.constant 0 : i32
    return %arg0, %c0_i32 : i32, i32
  }
}

module attributes {stable_mosaic.version = 11 : i64} {
  func.func @kernel(%arg0: i32, %arg1: memref<4x9x9x4xbf16, #tpu.memory_space<vmem>>, %arg2: memref<9x4x4xbf16, #tpu.memory_space<vmem>>, %arg3: memref<1x4xf32, #tpu.memory_space<vmem>>, %arg4: memref<1x4xf32, #tpu.memory_space<vmem>>) attributes {dimension_semantics = [#tpu.dimension_semantics<arbitrary>], iteration_bounds = array<i64: 2>, scalar_prefetch = 0 : i64, scratch_operands = 0 : i64, tpu.core_type = #tpu.core_type<tc>, window_params = [{transform_indices = @transform_0, window_bounds = array<i64: 4, 9, 9, 4>}, {pipeline_mode = #tpu.pipeline_mode<synchronous>, transform_indices = @transform_1, window_bounds = array<i64: 9, 4, 4>}, {pipeline_mode = #tpu.pipeline_mode<synchronous>, transform_indices = @transform_2, window_bounds = array<i64: 1, 4>}, {pipeline_mode = #tpu.pipeline_mode<synchronous>, transform_indices = @transform_3, window_bounds = array<i64: 1, 4>}]} {
    %c0_i32 = arith.constant 0 : i32
    %0 = arith.cmpi eq, %arg0, %c0_i32 : i32
    %1 = arith.extui %0 : i1 to i32
    %c0_i32_0 = arith.constant 0 : i32
    %2 = arith.cmpi ne, %1, %c0_i32_0 : i32
    scf.if %2 {
      %cst_29 = arith.constant 0.000000e+00 : f32
      %30 = vector.broadcast %cst_29 : f32 to vector<1x4xf32>
      %c0_30 = arith.constant 0 : index
      %c0_31 = arith.constant 0 : index
      %31 = vector.load %arg3[%c0_30, %c0_31] : memref<1x4xf32, #tpu.memory_space<vmem>>, vector<1x4xf32>
      tpu.vector_store %arg3[%c0_30, %c0_31], %30 {strides = array<i32>} : memref<1x4xf32, #tpu.memory_space<vmem>>, vector<1x4xf32>,
      %cst_32 = arith.constant 0.000000e+00 : f32
      %32 = vector.broadcast %cst_32 : f32 to vector<1x4xf32>
      %c0_33 = arith.constant 0 : index
      %c0_34 = arith.constant 0 : index
      %33 = vector.load %arg4[%c0_33, %c0_34] : memref<1x4xf32, #tpu.memory_space<vmem>>, vector<1x4xf32>
      tpu.vector_store %arg4[%c0_33, %c0_34], %32 {strides = array<i32>} : memref<1x4xf32, #tpu.memory_space<vmem>>, vector<1x4xf32>,
    } else {
    }
    %c0 = arith.constant 0 : index
    %c0_1 = arith.constant 0 : index
    %c0_2 = arith.constant 0 : index
    %3 = vector.load %arg2[%c0, %c0_1, %c0_2] : memref<9x4x4xbf16, #tpu.memory_space<vmem>>, vector<1x4x4xbf16>
    %4 = vector.shape_cast %3 : vector<1x4x4xbf16> to vector<4x4xbf16>
    %c1 = arith.constant 1 : index
    %c0_3 = arith.constant 0 : index
    %c0_4 = arith.constant 0 : index
    %5 = vector.load %arg2[%c1, %c0_3, %c0_4] : memref<9x4x4xbf16, #tpu.memory_space<vmem>>, vector<1x4x4xbf16>
    %6 = vector.shape_cast %5 : vector<1x4x4xbf16> to vector<4x4xbf16>
    %c2 = arith.constant 2 : index
    %c0_5 = arith.constant 0 : index
    %c0_6 = arith.constant 0 : index
    %7 = vector.load %arg2[%c2, %c0_5, %c0_6] : memref<9x4x4xbf16, #tpu.memory_space<vmem>>, vector<1x4x4xbf16>
    %8 = vector.shape_cast %7 : vector<1x4x4xbf16> to vector<4x4xbf16>
    %c3 = arith.constant 3 : index
    %c0_7 = arith.constant 0 : index
    %c0_8 = arith.constant 0 : index
    %9 = vector.load %arg2[%c3, %c0_7, %c0_8] : memref<9x4x4xbf16, #tpu.memory_space<vmem>>, vector<1x4x4xbf16>
    %10 = vector.shape_cast %9 : vector<1x4x4xbf16> to vector<4x4xbf16>
    %c4 = arith.constant 4 : index
    %c0_9 = arith.constant 0 : index
    %c0_10 = arith.constant 0 : index
    %11 = vector.load %arg2[%c4, %c0_9, %c0_10] : memref<9x4x4xbf16, #tpu.memory_space<vmem>>, vector<1x4x4xbf16>
    %12 = vector.shape_cast %11 : vector<1x4x4xbf16> to vector<4x4xbf16>
    %c5 = arith.constant 5 : index
    %c0_11 = arith.constant 0 : index
    %c0_12 = arith.constant 0 : index
    %13 = vector.load %arg2[%c5, %c0_11, %c0_12] : memref<9x4x4xbf16, #tpu.memory_space<vmem>>, vector<1x4x4xbf16>
    %14 = vector.shape_cast %13 : vector<1x4x4xbf16> to vector<4x4xbf16>
    %c6 = arith.constant 6 : index
    %c0_13 = arith.constant 0 : index
    %c0_14 = arith.constant 0 : index
    %15 = vector.load %arg2[%c6, %c0_13, %c0_14] : memref<9x4x4xbf16, #tpu.memory_space<vmem>>, vector<1x4x4xbf16>
    %16 = vector.shape_cast %15 : vector<1x4x4xbf16> to vector<4x4xbf16>
    %c7 = arith.constant 7 : index
    %c0_15 = arith.constant 0 : index
    %c0_16 = arith.constant 0 : index
    %17 = vector.load %arg2[%c7, %c0_15, %c0_16] : memref<9x4x4xbf16, #tpu.memory_space<vmem>>, vector<1x4x4xbf16>
    %18 = vector.shape_cast %17 : vector<1x4x4xbf16> to vector<4x4xbf16>
    %c8 = arith.constant 8 : index
    %c0_17 = arith.constant 0 : index
    %c0_18 = arith.constant 0 : index
    %19 = vector.load %arg2[%c8, %c0_17, %c0_18] : memref<9x4x4xbf16, #tpu.memory_space<vmem>>, vector<1x4x4xbf16>
    %20 = vector.shape_cast %19 : vector<1x4x4xbf16> to vector<4x4xbf16>
    %cst = arith.constant 0.000000e+00 : f32
    %21 = vector.broadcast %cst : f32 to vector<1x4xf32>
    %c0_i32_19 = arith.constant 0 : i32
    %c8_i32 = arith.constant 8 : i32
    %22 = arith.addi %c0_i32_19, %c8_i32 : i32
    %c1_i32 = arith.constant 1 : i32
    %23:2 = scf.for %arg5 = %c0_i32_19 to %22 step %c1_i32 iter_args(%arg6 = %21, %arg7 = %21) -> (vector<1x4xf32>, vector<1x4xf32>)  : i32 {
      %cst_29 = arith.constant 0.000000e+00 : f32
      %30 = vector.broadcast %cst_29 : f32 to vector<8x4xf32>
      %c0_i32_30 = arith.constant 0 : i32
      %31 = arith.addi %c0_i32_30, %arg5 : i32
      %c0_31 = arith.constant 0 : index
      %32 = arith.index_cast %31 : i32 to index
      %c0_32 = arith.constant 0 : index
      %c0_33 = arith.constant 0 : index
      %33 = vector.load %arg1[%c0_31, %32, %c0_32, %c0_33] : memref<4x9x9x4xbf16, #tpu.memory_space<vmem>>, vector<1x1x8x4xbf16>
      %34 = vector.shape_cast %33 : vector<1x1x8x4xbf16> to vector<8x4xbf16>
      %cst_34 = arith.constant dense<0.000000e+00> : vector<8x4xf32>
      %35 = tpu.matmul %34, %4, %cst_34 {dimension_numbers = #tpu.dot_dimension_numbers<[1], [0], [0], [1], [0, 0, 1, 1], [], []>} : vector<8x4xbf16>, vector<4x4xbf16>, vector<8x4xf32> -> vector<8x4xf32>
      %36 = arith.addf %30, %35 : vector<8x4xf32>
      %c0_i32_35 = arith.constant 0 : i32
      %37 = arith.addi %c0_i32_35, %arg5 : i32
      %c1_36 = arith.constant 1 : index
      %38 = arith.index_cast %37 : i32 to index
      %c0_37 = arith.constant 0 : index
      %c0_38 = arith.constant 0 : index
      %39 = vector.load %arg1[%c1_36, %38, %c0_37, %c0_38] : memref<4x9x9x4xbf16, #tpu.memory_space<vmem>>, vector<1x1x8x4xbf16>
      %40 = vector.shape_cast %39 : vector<1x1x8x4xbf16> to vector<8x4xbf16>
      %cst_39 = arith.constant dense<0.000000e+00> : vector<8x4xf32>
      %41 = tpu.matmul %40, %6, %cst_39 {dimension_numbers = #tpu.dot_dimension_numbers<[1], [0], [0], [1], [0, 0, 1, 1], [], []>} : vector<8x4xbf16>, vector<4x4xbf16>, vector<8x4xf32> -> vector<8x4xf32>
      %42 = arith.addf %36, %41 : vector<8x4xf32>
      %c0_i32_40 = arith.constant 0 : i32
      %43 = arith.addi %c0_i32_40, %arg5 : i32
      %c0_41 = arith.constant 0 : index
      %44 = arith.index_cast %43 : i32 to index
      %c1_42 = arith.constant 1 : index
      %c0_43 = arith.constant 0 : index
      %45 = vector.load %arg1[%c0_41, %44, %c1_42, %c0_43] : memref<4x9x9x4xbf16, #tpu.memory_space<vmem>>, vector<1x1x8x4xbf16>
      %46 = vector.shape_cast %45 : vector<1x1x8x4xbf16> to vector<8x4xbf16>
      %cst_44 = arith.constant dense<0.000000e+00> : vector<8x4xf32>
      %47 = tpu.matmul %46, %8, %cst_44 {dimension_numbers = #tpu.dot_dimension_numbers<[1], [0], [0], [1], [0, 0, 1, 1], [], []>} : vector<8x4xbf16>, vector<4x4xbf16>, vector<8x4xf32> -> vector<8x4xf32>
      %48 = arith.addf %42, %47 : vector<8x4xf32>
      %c0_i32_45 = arith.constant 0 : i32
      %49 = arith.addi %c0_i32_45, %arg5 : i32
      %c2_46 = arith.constant 2 : index
      %50 = arith.index_cast %49 : i32 to index
      %c0_47 = arith.constant 0 : index
      %c0_48 = arith.constant 0 : index
      %51 = vector.load %arg1[%c2_46, %50, %c0_47, %c0_48] : memref<4x9x9x4xbf16, #tpu.memory_space<vmem>>, vector<1x1x8x4xbf16>
      %52 = vector.shape_cast %51 : vector<1x1x8x4xbf16> to vector<8x4xbf16>
      %cst_49 = arith.constant dense<0.000000e+00> : vector<8x4xf32>
      %53 = tpu.matmul %52, %10, %cst_49 {dimension_numbers = #tpu.dot_dimension_numbers<[1], [0], [0], [1], [0, 0, 1, 1], [], []>} : vector<8x4xbf16>, vector<4x4xbf16>, vector<8x4xf32> -> vector<8x4xf32>
      %54 = arith.addf %48, %53 : vector<8x4xf32>
      %c0_i32_50 = arith.constant 0 : i32
      %55 = arith.addi %c0_i32_50, %arg5 : i32
      %c3_51 = arith.constant 3 : index
      %56 = arith.index_cast %55 : i32 to index
      %c0_52 = arith.constant 0 : index
      %c0_53 = arith.constant 0 : index
      %57 = vector.load %arg1[%c3_51, %56, %c0_52, %c0_53] : memref<4x9x9x4xbf16, #tpu.memory_space<vmem>>, vector<1x1x8x4xbf16>
      %58 = vector.shape_cast %57 : vector<1x1x8x4xbf16> to vector<8x4xbf16>
      %cst_54 = arith.constant dense<0.000000e+00> : vector<8x4xf32>
      %59 = tpu.matmul %58, %12, %cst_54 {dimension_numbers = #tpu.dot_dimension_numbers<[1], [0], [0], [1], [0, 0, 1, 1], [], []>} : vector<8x4xbf16>, vector<4x4xbf16>, vector<8x4xf32> -> vector<8x4xf32>
      %60 = arith.addf %54, %59 : vector<8x4xf32>
      %c0_i32_55 = arith.constant 0 : i32
      %61 = arith.addi %c0_i32_55, %arg5 : i32
      %c2_56 = arith.constant 2 : index
      %62 = arith.index_cast %61 : i32 to index
      %c1_57 = arith.constant 1 : index
      %c0_58 = arith.constant 0 : index
      %63 = vector.load %arg1[%c2_56, %62, %c1_57, %c0_58] : memref<4x9x9x4xbf16, #tpu.memory_space<vmem>>, vector<1x1x8x4xbf16>
      %64 = vector.shape_cast %63 : vector<1x1x8x4xbf16> to vector<8x4xbf16>
      %cst_59 = arith.constant dense<0.000000e+00> : vector<8x4xf32>
      %65 = tpu.matmul %64, %14, %cst_59 {dimension_numbers = #tpu.dot_dimension_numbers<[1], [0], [0], [1], [0, 0, 1, 1], [], []>} : vector<8x4xbf16>, vector<4x4xbf16>, vector<8x4xf32> -> vector<8x4xf32>
      %66 = arith.addf %60, %65 : vector<8x4xf32>
      %c1_i32_60 = arith.constant 1 : i32
      %67 = arith.addi %c1_i32_60, %arg5 : i32
      %c0_61 = arith.constant 0 : index
      %68 = arith.index_cast %67 : i32 to index
      %c0_62 = arith.constant 0 : index
      %c0_63 = arith.constant 0 : index
      %69 = vector.load %arg1[%c0_61, %68, %c0_62, %c0_63] : memref<4x9x9x4xbf16, #tpu.memory_space<vmem>>, vector<1x1x8x4xbf16>
      %70 = vector.shape_cast %69 : vector<1x1x8x4xbf16> to vector<8x4xbf16>
      %cst_64 = arith.constant dense<0.000000e+00> : vector<8x4xf32>
      %71 = tpu.matmul %70, %16, %cst_64 {dimension_numbers = #tpu.dot_dimension_numbers<[1], [0], [0], [1], [0, 0, 1, 1], [], []>} : vector<8x4xbf16>, vector<4x4xbf16>, vector<8x4xf32> -> vector<8x4xf32>
      %72 = arith.addf %66, %71 : vector<8x4xf32>
      %c1_i32_65 = arith.constant 1 : i32
      %73 = arith.addi %c1_i32_65, %arg5 : i32
      %c1_66 = arith.constant 1 : index
      %74 = arith.index_cast %73 : i32 to index
      %c0_67 = arith.constant 0 : index
      %c0_68 = arith.constant 0 : index
      %75 = vector.load %arg1[%c1_66, %74, %c0_67, %c0_68] : memref<4x9x9x4xbf16, #tpu.memory_space<vmem>>, vector<1x1x8x4xbf16>
      %76 = vector.shape_cast %75 : vector<1x1x8x4xbf16> to vector<8x4xbf16>
      %cst_69 = arith.constant dense<0.000000e+00> : vector<8x4xf32>
      %77 = tpu.matmul %76, %18, %cst_69 {dimension_numbers = #tpu.dot_dimension_numbers<[1], [0], [0], [1], [0, 0, 1, 1], [], []>} : vector<8x4xbf16>, vector<4x4xbf16>, vector<8x4xf32> -> vector<8x4xf32>
      %78 = arith.addf %72, %77 : vector<8x4xf32>
      %c1_i32_70 = arith.constant 1 : i32
      %79 = arith.addi %c1_i32_70, %arg5 : i32
      %c0_71 = arith.constant 0 : index
      %80 = arith.index_cast %79 : i32 to index
      %c1_72 = arith.constant 1 : index
      %c0_73 = arith.constant 0 : index
      %81 = vector.load %arg1[%c0_71, %80, %c1_72, %c0_73] : memref<4x9x9x4xbf16, #tpu.memory_space<vmem>>, vector<1x1x8x4xbf16>
      %82 = vector.shape_cast %81 : vector<1x1x8x4xbf16> to vector<8x4xbf16>
      %cst_74 = arith.constant dense<0.000000e+00> : vector<8x4xf32>
      %83 = tpu.matmul %82, %20, %cst_74 {dimension_numbers = #tpu.dot_dimension_numbers<[1], [0], [0], [1], [0, 0, 1, 1], [], []>} : vector<8x4xbf16>, vector<4x4xbf16>, vector<8x4xf32> -> vector<8x4xf32>
      %84 = arith.addf %78, %83 : vector<8x4xf32>
      %cst_75 = arith.constant dense<0.000000e+00> : vector<4xf32>
      %85 = vector.multi_reduction <add>, %84, %cst_75 [0] : vector<8x4xf32> to vector<4xf32>
      %86 = vector.shape_cast %85 : vector<4xf32> to vector<1x4xf32>
      %87 = arith.addf %arg6, %86 : vector<1x4xf32>
      %88 = arith.mulf %84, %84 : vector<8x4xf32>
      %cst_76 = arith.constant dense<0.000000e+00> : vector<4xf32>
      %89 = vector.multi_reduction <add>, %88, %cst_76 [0] : vector<8x4xf32> to vector<4xf32>
      %90 = vector.shape_cast %89 : vector<4xf32> to vector<1x4xf32>
      %91 = arith.addf %arg7, %90 : vector<1x4xf32>
      scf.yield %87, %91 : vector<1x4xf32>, vector<1x4xf32>
    }
    %c8_i32_20 = arith.constant 8 : i32
    %c0_21 = arith.constant 0 : index
    %c0_22 = arith.constant 0 : index
    %24 = vector.load %arg3[%c0_21, %c0_22] : memref<1x4xf32, #tpu.memory_space<vmem>>, vector<1x4xf32>
    %25 = arith.addf %24, %23#0 : vector<1x4xf32>
    %c0_23 = arith.constant 0 : index
    %c0_24 = arith.constant 0 : index
    %26 = vector.load %arg3[%c0_23, %c0_24] : memref<1x4xf32, #tpu.memory_space<vmem>>, vector<1x4xf32>
    tpu.vector_store %arg3[%c0_23, %c0_24], %25 {strides = array<i32>} : memref<1x4xf32, #tpu.memory_space<vmem>>, vector<1x4xf32>,
    %c0_25 = arith.constant 0 : index
    %c0_26 = arith.constant 0 : index
    %27 = vector.load %arg4[%c0_25, %c0_26] : memref<1x4xf32, #tpu.memory_space<vmem>>, vector<1x4xf32>
    %28 = arith.addf %27, %23#1 : vector<1x4xf32>
    %c0_27 = arith.constant 0 : index
    %c0_28 = arith.constant 0 : index
    %29 = vector.load %arg4[%c0_27, %c0_28] : memref<1x4xf32, #tpu.memory_space<vmem>>, vector<1x4xf32>
    tpu.vector_store %arg4[%c0_27, %c0_28], %28 {strides = array<i32>} : memref<1x4xf32, #tpu.memory_space<vmem>>, vector<1x4xf32>,
    return
  }
  func.func @transform_0(%arg0: i32) -> (i32, i32, i32, i32) {
    %c0_i32 = arith.constant 0 : i32
    %c0_i32_0 = arith.constant 0 : i32
    %c0_i32_1 = arith.constant 0 : i32
    %c0_i32_2 = arith.constant 0 : i32
    return %arg0, %c0_i32, %c0_i32_0, %c0_i32_1 : i32, i32, i32, i32
  }
  func.func @transform_1(%arg0: i32) -> (i32, i32, i32) {
    %c0_i32 = arith.constant 0 : i32
    %c0_i32_0 = arith.constant 0 : i32
    %c0_i32_1 = arith.constant 0 : i32
    %c0_i32_2 = arith.constant 0 : i32
    return %c0_i32, %c0_i32_0, %c0_i32_1 : i32, i32, i32
  }
  func.func @transform_2(%arg0: i32) -> (i32, i32) {
    %c0_i32 = arith.constant 0 : i32
    %c0_i32_0 = arith.constant 0 : i32
    %c0_i32_1 = arith.constant 0 : i32
    return %c0_i32, %c0_i32_0 : i32, i32
  }
  func.func @transform_3(%arg0: i32) -> (i32, i32) {
    %c0_i32 = arith.constant 0 : i32
    %c0_i32_0 = arith.constant 0 : i32
    %c0_i32_1 = arith.constant 0 : i32
    return %c0_i32, %c0_i32_0 : i32, i32
  }
}

module attributes {stable_mosaic.version = 11 : i64} {
  func.func @kernel(%arg0: i32, %arg1: memref<4x9x9x4xbf16, #tpu.memory_space<vmem>>, %arg2: memref<9x4x4xbf16, #tpu.memory_space<vmem>>, %arg3: memref<1x4xf32, #tpu.memory_space<vmem>>, %arg4: memref<1x4xf32, #tpu.memory_space<vmem>>, %arg5: memref<1x4xf32, #tpu.memory_space<vmem>>, %arg6: memref<1x4xf32, #tpu.memory_space<vmem>>, %arg7: memref<64x4xbf16, #tpu.memory_space<vmem>>) attributes {dimension_semantics = [#tpu.dimension_semantics<parallel>], iteration_bounds = array<i64: 2>, scalar_prefetch = 0 : i64, scratch_operands = 0 : i64, tpu.core_type = #tpu.core_type<tc>, window_params = [{transform_indices = @transform_0, window_bounds = array<i64: 4, 9, 9, 4>}, {pipeline_mode = #tpu.pipeline_mode<synchronous>, transform_indices = @transform_1, window_bounds = array<i64: 9, 4, 4>}, {pipeline_mode = #tpu.pipeline_mode<synchronous>, transform_indices = @transform_2, window_bounds = array<i64: 1, 4>}, {pipeline_mode = #tpu.pipeline_mode<synchronous>, transform_indices = @transform_3, window_bounds = array<i64: 1, 4>}, {pipeline_mode = #tpu.pipeline_mode<synchronous>, transform_indices = @transform_4, window_bounds = array<i64: 1, 4>}, {pipeline_mode = #tpu.pipeline_mode<synchronous>, transform_indices = @transform_5, window_bounds = array<i64: 1, 4>}, {transform_indices = @transform_6, window_bounds = array<i64: 64, 4>}]} {
    %c0 = arith.constant 0 : index
    %c0_0 = arith.constant 0 : index
    %0 = vector.load %arg3[%c0, %c0_0] : memref<1x4xf32, #tpu.memory_space<vmem>>, vector<1x4xf32>
    %c0_1 = arith.constant 0 : index
    %c0_2 = arith.constant 0 : index
    %1 = vector.load %arg4[%c0_1, %c0_2] : memref<1x4xf32, #tpu.memory_space<vmem>>, vector<1x4xf32>
    %c0_3 = arith.constant 0 : index
    %c0_4 = arith.constant 0 : index
    %2 = vector.load %arg5[%c0_3, %c0_4] : memref<1x4xf32, #tpu.memory_space<vmem>>, vector<1x4xf32>
    %c0_5 = arith.constant 0 : index
    %c0_6 = arith.constant 0 : index
    %3 = vector.load %arg6[%c0_5, %c0_6] : memref<1x4xf32, #tpu.memory_space<vmem>>, vector<1x4xf32>
    %cst = arith.constant 7.812500e-03 : f32
    %4 = vector.broadcast %cst : f32 to vector<1x4xf32>
    %5 = arith.mulf %0, %4 : vector<1x4xf32>
    %cst_7 = arith.constant 7.812500e-03 : f32
    %6 = vector.broadcast %cst_7 : f32 to vector<1x4xf32>
    %7 = arith.mulf %1, %6 : vector<1x4xf32>
    %8 = arith.mulf %5, %5 : vector<1x4xf32>
    %9 = arith.subf %7, %8 : vector<1x4xf32>
    %cst_8 = arith.constant 9.99999974E-6 : f32
    %10 = vector.broadcast %cst_8 : f32 to vector<1x4xf32>
    %11 = arith.addf %9, %10 : vector<1x4xf32>
    %12 = math.rsqrt %11 : vector<1x4xf32>
    %13 = arith.mulf %2, %12 : vector<1x4xf32>
    %14 = arith.mulf %5, %13 : vector<1x4xf32>
    %15 = arith.subf %3, %14 : vector<1x4xf32>
    %c0_9 = arith.constant 0 : index
    %c0_10 = arith.constant 0 : index
    %c0_11 = arith.constant 0 : index
    %16 = vector.load %arg2[%c0_9, %c0_10, %c0_11] : memref<9x4x4xbf16, #tpu.memory_space<vmem>>, vector<1x4x4xbf16>
    %17 = vector.shape_cast %16 : vector<1x4x4xbf16> to vector<4x4xbf16>
    %c1 = arith.constant 1 : index
    %c0_12 = arith.constant 0 : index
    %c0_13 = arith.constant 0 : index
    %18 = vector.load %arg2[%c1, %c0_12, %c0_13] : memref<9x4x4xbf16, #tpu.memory_space<vmem>>, vector<1x4x4xbf16>
    %19 = vector.shape_cast %18 : vector<1x4x4xbf16> to vector<4x4xbf16>
    %c2 = arith.constant 2 : index
    %c0_14 = arith.constant 0 : index
    %c0_15 = arith.constant 0 : index
    %20 = vector.load %arg2[%c2, %c0_14, %c0_15] : memref<9x4x4xbf16, #tpu.memory_space<vmem>>, vector<1x4x4xbf16>
    %21 = vector.shape_cast %20 : vector<1x4x4xbf16> to vector<4x4xbf16>
    %c3 = arith.constant 3 : index
    %c0_16 = arith.constant 0 : index
    %c0_17 = arith.constant 0 : index
    %22 = vector.load %arg2[%c3, %c0_16, %c0_17] : memref<9x4x4xbf16, #tpu.memory_space<vmem>>, vector<1x4x4xbf16>
    %23 = vector.shape_cast %22 : vector<1x4x4xbf16> to vector<4x4xbf16>
    %c4 = arith.constant 4 : index
    %c0_18 = arith.constant 0 : index
    %c0_19 = arith.constant 0 : index
    %24 = vector.load %arg2[%c4, %c0_18, %c0_19] : memref<9x4x4xbf16, #tpu.memory_space<vmem>>, vector<1x4x4xbf16>
    %25 = vector.shape_cast %24 : vector<1x4x4xbf16> to vector<4x4xbf16>
    %c5 = arith.constant 5 : index
    %c0_20 = arith.constant 0 : index
    %c0_21 = arith.constant 0 : index
    %26 = vector.load %arg2[%c5, %c0_20, %c0_21] : memref<9x4x4xbf16, #tpu.memory_space<vmem>>, vector<1x4x4xbf16>
    %27 = vector.shape_cast %26 : vector<1x4x4xbf16> to vector<4x4xbf16>
    %c6 = arith.constant 6 : index
    %c0_22 = arith.constant 0 : index
    %c0_23 = arith.constant 0 : index
    %28 = vector.load %arg2[%c6, %c0_22, %c0_23] : memref<9x4x4xbf16, #tpu.memory_space<vmem>>, vector<1x4x4xbf16>
    %29 = vector.shape_cast %28 : vector<1x4x4xbf16> to vector<4x4xbf16>
    %c7 = arith.constant 7 : index
    %c0_24 = arith.constant 0 : index
    %c0_25 = arith.constant 0 : index
    %30 = vector.load %arg2[%c7, %c0_24, %c0_25] : memref<9x4x4xbf16, #tpu.memory_space<vmem>>, vector<1x4x4xbf16>
    %31 = vector.shape_cast %30 : vector<1x4x4xbf16> to vector<4x4xbf16>
    %c8 = arith.constant 8 : index
    %c0_26 = arith.constant 0 : index
    %c0_27 = arith.constant 0 : index
    %32 = vector.load %arg2[%c8, %c0_26, %c0_27] : memref<9x4x4xbf16, #tpu.memory_space<vmem>>, vector<1x4x4xbf16>
    %33 = vector.shape_cast %32 : vector<1x4x4xbf16> to vector<4x4xbf16>
    %c0_i32 = arith.constant 0 : i32
    %c8_i32 = arith.constant 8 : i32
    %34 = arith.addi %c0_i32, %c8_i32 : i32
    %c1_i32 = arith.constant 1 : i32
    scf.for %arg8 = %c0_i32 to %34 step %c1_i32  : i32 {
      %cst_29 = arith.constant 0.000000e+00 : f32
      %35 = vector.broadcast %cst_29 : f32 to vector<8x4xf32>
      %c0_i32_30 = arith.constant 0 : i32
      %36 = arith.addi %c0_i32_30, %arg8 : i32
      %c0_31 = arith.constant 0 : index
      %37 = arith.index_cast %36 : i32 to index
      %c0_32 = arith.constant 0 : index
      %c0_33 = arith.constant 0 : index
      %38 = vector.load %arg1[%c0_31, %37, %c0_32, %c0_33] : memref<4x9x9x4xbf16, #tpu.memory_space<vmem>>, vector<1x1x8x4xbf16>
      %39 = vector.shape_cast %38 : vector<1x1x8x4xbf16> to vector<8x4xbf16>
      %cst_34 = arith.constant dense<0.000000e+00> : vector<8x4xf32>
      %40 = tpu.matmul %39, %17, %cst_34 {dimension_numbers = #tpu.dot_dimension_numbers<[1], [0], [0], [1], [0, 0, 1, 1], [], []>} : vector<8x4xbf16>, vector<4x4xbf16>, vector<8x4xf32> -> vector<8x4xf32>
      %41 = arith.addf %35, %40 : vector<8x4xf32>
      %c0_i32_35 = arith.constant 0 : i32
      %42 = arith.addi %c0_i32_35, %arg8 : i32
      %c1_36 = arith.constant 1 : index
      %43 = arith.index_cast %42 : i32 to index
      %c0_37 = arith.constant 0 : index
      %c0_38 = arith.constant 0 : index
      %44 = vector.load %arg1[%c1_36, %43, %c0_37, %c0_38] : memref<4x9x9x4xbf16, #tpu.memory_space<vmem>>, vector<1x1x8x4xbf16>
      %45 = vector.shape_cast %44 : vector<1x1x8x4xbf16> to vector<8x4xbf16>
      %cst_39 = arith.constant dense<0.000000e+00> : vector<8x4xf32>
      %46 = tpu.matmul %45, %19, %cst_39 {dimension_numbers = #tpu.dot_dimension_numbers<[1], [0], [0], [1], [0, 0, 1, 1], [], []>} : vector<8x4xbf16>, vector<4x4xbf16>, vector<8x4xf32> -> vector<8x4xf32>
      %47 = arith.addf %41, %46 : vector<8x4xf32>
      %c0_i32_40 = arith.constant 0 : i32
      %48 = arith.addi %c0_i32_40, %arg8 : i32
      %c0_41 = arith.constant 0 : index
      %49 = arith.index_cast %48 : i32 to index
      %c1_42 = arith.constant 1 : index
      %c0_43 = arith.constant 0 : index
      %50 = vector.load %arg1[%c0_41, %49, %c1_42, %c0_43] : memref<4x9x9x4xbf16, #tpu.memory_space<vmem>>, vector<1x1x8x4xbf16>
      %51 = vector.shape_cast %50 : vector<1x1x8x4xbf16> to vector<8x4xbf16>
      %cst_44 = arith.constant dense<0.000000e+00> : vector<8x4xf32>
      %52 = tpu.matmul %51, %21, %cst_44 {dimension_numbers = #tpu.dot_dimension_numbers<[1], [0], [0], [1], [0, 0, 1, 1], [], []>} : vector<8x4xbf16>, vector<4x4xbf16>, vector<8x4xf32> -> vector<8x4xf32>
      %53 = arith.addf %47, %52 : vector<8x4xf32>
      %c0_i32_45 = arith.constant 0 : i32
      %54 = arith.addi %c0_i32_45, %arg8 : i32
      %c2_46 = arith.constant 2 : index
      %55 = arith.index_cast %54 : i32 to index
      %c0_47 = arith.constant 0 : index
      %c0_48 = arith.constant 0 : index
      %56 = vector.load %arg1[%c2_46, %55, %c0_47, %c0_48] : memref<4x9x9x4xbf16, #tpu.memory_space<vmem>>, vector<1x1x8x4xbf16>
      %57 = vector.shape_cast %56 : vector<1x1x8x4xbf16> to vector<8x4xbf16>
      %cst_49 = arith.constant dense<0.000000e+00> : vector<8x4xf32>
      %58 = tpu.matmul %57, %23, %cst_49 {dimension_numbers = #tpu.dot_dimension_numbers<[1], [0], [0], [1], [0, 0, 1, 1], [], []>} : vector<8x4xbf16>, vector<4x4xbf16>, vector<8x4xf32> -> vector<8x4xf32>
      %59 = arith.addf %53, %58 : vector<8x4xf32>
      %c0_i32_50 = arith.constant 0 : i32
      %60 = arith.addi %c0_i32_50, %arg8 : i32
      %c3_51 = arith.constant 3 : index
      %61 = arith.index_cast %60 : i32 to index
      %c0_52 = arith.constant 0 : index
      %c0_53 = arith.constant 0 : index
      %62 = vector.load %arg1[%c3_51, %61, %c0_52, %c0_53] : memref<4x9x9x4xbf16, #tpu.memory_space<vmem>>, vector<1x1x8x4xbf16>
      %63 = vector.shape_cast %62 : vector<1x1x8x4xbf16> to vector<8x4xbf16>
      %cst_54 = arith.constant dense<0.000000e+00> : vector<8x4xf32>
      %64 = tpu.matmul %63, %25, %cst_54 {dimension_numbers = #tpu.dot_dimension_numbers<[1], [0], [0], [1], [0, 0, 1, 1], [], []>} : vector<8x4xbf16>, vector<4x4xbf16>, vector<8x4xf32> -> vector<8x4xf32>
      %65 = arith.addf %59, %64 : vector<8x4xf32>
      %c0_i32_55 = arith.constant 0 : i32
      %66 = arith.addi %c0_i32_55, %arg8 : i32
      %c2_56 = arith.constant 2 : index
      %67 = arith.index_cast %66 : i32 to index
      %c1_57 = arith.constant 1 : index
      %c0_58 = arith.constant 0 : index
      %68 = vector.load %arg1[%c2_56, %67, %c1_57, %c0_58] : memref<4x9x9x4xbf16, #tpu.memory_space<vmem>>, vector<1x1x8x4xbf16>
      %69 = vector.shape_cast %68 : vector<1x1x8x4xbf16> to vector<8x4xbf16>
      %cst_59 = arith.constant dense<0.000000e+00> : vector<8x4xf32>
      %70 = tpu.matmul %69, %27, %cst_59 {dimension_numbers = #tpu.dot_dimension_numbers<[1], [0], [0], [1], [0, 0, 1, 1], [], []>} : vector<8x4xbf16>, vector<4x4xbf16>, vector<8x4xf32> -> vector<8x4xf32>
      %71 = arith.addf %65, %70 : vector<8x4xf32>
      %c1_i32_60 = arith.constant 1 : i32
      %72 = arith.addi %c1_i32_60, %arg8 : i32
      %c0_61 = arith.constant 0 : index
      %73 = arith.index_cast %72 : i32 to index
      %c0_62 = arith.constant 0 : index
      %c0_63 = arith.constant 0 : index
      %74 = vector.load %arg1[%c0_61, %73, %c0_62, %c0_63] : memref<4x9x9x4xbf16, #tpu.memory_space<vmem>>, vector<1x1x8x4xbf16>
      %75 = vector.shape_cast %74 : vector<1x1x8x4xbf16> to vector<8x4xbf16>
      %cst_64 = arith.constant dense<0.000000e+00> : vector<8x4xf32>
      %76 = tpu.matmul %75, %29, %cst_64 {dimension_numbers = #tpu.dot_dimension_numbers<[1], [0], [0], [1], [0, 0, 1, 1], [], []>} : vector<8x4xbf16>, vector<4x4xbf16>, vector<8x4xf32> -> vector<8x4xf32>
      %77 = arith.addf %71, %76 : vector<8x4xf32>
      %c1_i32_65 = arith.constant 1 : i32
      %78 = arith.addi %c1_i32_65, %arg8 : i32
      %c1_66 = arith.constant 1 : index
      %79 = arith.index_cast %78 : i32 to index
      %c0_67 = arith.constant 0 : index
      %c0_68 = arith.constant 0 : index
      %80 = vector.load %arg1[%c1_66, %79, %c0_67, %c0_68] : memref<4x9x9x4xbf16, #tpu.memory_space<vmem>>, vector<1x1x8x4xbf16>
      %81 = vector.shape_cast %80 : vector<1x1x8x4xbf16> to vector<8x4xbf16>
      %cst_69 = arith.constant dense<0.000000e+00> : vector<8x4xf32>
      %82 = tpu.matmul %81, %31, %cst_69 {dimension_numbers = #tpu.dot_dimension_numbers<[1], [0], [0], [1], [0, 0, 1, 1], [], []>} : vector<8x4xbf16>, vector<4x4xbf16>, vector<8x4xf32> -> vector<8x4xf32>
      %83 = arith.addf %77, %82 : vector<8x4xf32>
      %c1_i32_70 = arith.constant 1 : i32
      %84 = arith.addi %c1_i32_70, %arg8 : i32
      %c0_71 = arith.constant 0 : index
      %85 = arith.index_cast %84 : i32 to index
      %c1_72 = arith.constant 1 : index
      %c0_73 = arith.constant 0 : index
      %86 = vector.load %arg1[%c0_71, %85, %c1_72, %c0_73] : memref<4x9x9x4xbf16, #tpu.memory_space<vmem>>, vector<1x1x8x4xbf16>
      %87 = vector.shape_cast %86 : vector<1x1x8x4xbf16> to vector<8x4xbf16>
      %cst_74 = arith.constant dense<0.000000e+00> : vector<8x4xf32>
      %88 = tpu.matmul %87, %33, %cst_74 {dimension_numbers = #tpu.dot_dimension_numbers<[1], [0], [0], [1], [0, 0, 1, 1], [], []>} : vector<8x4xbf16>, vector<4x4xbf16>, vector<8x4xf32> -> vector<8x4xf32>
      %89 = arith.addf %83, %88 : vector<8x4xf32>
      %90 = vector.broadcast %13 : vector<1x4xf32> to vector<8x4xf32>
      %91 = arith.mulf %89, %90 : vector<8x4xf32>
      %92 = vector.broadcast %15 : vector<1x4xf32> to vector<8x4xf32>
      %93 = arith.addf %91, %92 : vector<8x4xf32>
      %cst_75 = arith.constant 0.000000e+00 : f32
      %94 = vector.broadcast %cst_75 : f32 to vector<8x4xf32>
      %95 = arith.maximumf %93, %94 : vector<8x4xf32>
      %c8_i32_76 = arith.constant 8 : i32
      %96 = arith.muli %arg8, %c8_i32_76 : i32
      %97 = tpu.assume_multiple %96, 8 : i32
      %98 = arith.truncf %95 : vector<8x4xf32> to vector<8x4xbf16>
      %99 = arith.index_cast %97 : i32 to index
      %c0_77 = arith.constant 0 : index
      %100 = vector.load %arg7[%99, %c0_77] : memref<64x4xbf16, #tpu.memory_space<vmem>>, vector<8x4xbf16>
      tpu.vector_store %arg7[%99, %c0_77], %98 {strides = array<i32>} : memref<64x4xbf16, #tpu.memory_space<vmem>>, vector<8x4xbf16>,
    }
    %c8_i32_28 = arith.constant 8 : i32
    return
  }
  func.func @transform_0(%arg0: i32) -> (i32, i32, i32, i32) {
    %c0_i32 = arith.constant 0 : i32
    %c0_i32_0 = arith.constant 0 : i32
    %c0_i32_1 = arith.constant 0 : i32
    %c0_i32_2 = arith.constant 0 : i32
    return %arg0, %c0_i32, %c0_i32_0, %c0_i32_1 : i32, i32, i32, i32
  }
  func.func @transform_1(%arg0: i32) -> (i32, i32, i32) {
    %c0_i32 = arith.constant 0 : i32
    %c0_i32_0 = arith.constant 0 : i32
    %c0_i32_1 = arith.constant 0 : i32
    %c0_i32_2 = arith.constant 0 : i32
    return %c0_i32, %c0_i32_0, %c0_i32_1 : i32, i32, i32
  }
  func.func @transform_2(%arg0: i32) -> (i32, i32) {
    %c0_i32 = arith.constant 0 : i32
    %c0_i32_0 = arith.constant 0 : i32
    %c0_i32_1 = arith.constant 0 : i32
    return %c0_i32, %c0_i32_0 : i32, i32
  }
  func.func @transform_3(%arg0: i32) -> (i32, i32) {
    %c0_i32 = arith.constant 0 : i32
    %c0_i32_0 = arith.constant 0 : i32
    %c0_i32_1 = arith.constant 0 : i32
    return %c0_i32, %c0_i32_0 : i32, i32
  }
  func.func @transform_4(%arg0: i32) -> (i32, i32) {
    %c0_i32 = arith.constant 0 : i32
    %c0_i32_0 = arith.constant 0 : i32
    %c0_i32_1 = arith.constant 0 : i32
    return %c0_i32, %c0_i32_0 : i32, i32
  }
  func.func @transform_5(%arg0: i32) -> (i32, i32) {
    %c0_i32 = arith.constant 0 : i32
    %c0_i32_0 = arith.constant 0 : i32
    %c0_i32_1 = arith.constant 0 : i32
    return %c0_i32, %c0_i32_0 : i32, i32
  }
  func.func @transform_6(%arg0: i32) -> (i32, i32) {
    %c0_i32 = arith.constant 0 : i32
    %c0_i32_0 = arith.constant 0 : i32
    return %arg0, %c0_i32 : i32, i32
  }
}

module attributes {stable_mosaic.version = 11 : i64} {
  func.func @kernel(%arg0: i32, %arg1: memref<64x4xbf16, #tpu.memory_space<vmem>>, %arg2: memref<64x4xbf16, #tpu.memory_space<vmem>>, %arg3: memref<4x16xbf16, #tpu.memory_space<vmem>>, %arg4: memref<4x16xbf16, #tpu.memory_space<vmem>>, %arg5: memref<1x16xf32, #tpu.memory_space<vmem>>, %arg6: memref<1x16xf32, #tpu.memory_space<vmem>>, %arg7: memref<1x16xf32, #tpu.memory_space<vmem>>, %arg8: memref<1x16xf32, #tpu.memory_space<vmem>>, %arg9: memref<1x16xf32, #tpu.memory_space<vmem>>, %arg10: memref<1x16xf32, #tpu.memory_space<vmem>>, %arg11: memref<1x16xf32, #tpu.memory_space<vmem>>, %arg12: memref<1x16xf32, #tpu.memory_space<vmem>>, %arg13: memref<64x16xf32, #tpu.memory_space<vmem>>) attributes {dimension_semantics = [#tpu.dimension_semantics<parallel>], iteration_bounds = array<i64: 2>, scalar_prefetch = 0 : i64, scratch_operands = 0 : i64, tpu.core_type = #tpu.core_type<tc>, window_params = [{transform_indices = @transform_0, window_bounds = array<i64: 64, 4>}, {transform_indices = @transform_1, window_bounds = array<i64: 64, 4>}, {pipeline_mode = #tpu.pipeline_mode<synchronous>, transform_indices = @transform_2, window_bounds = array<i64: 4, 16>}, {pipeline_mode = #tpu.pipeline_mode<synchronous>, transform_indices = @transform_3, window_bounds = array<i64: 4, 16>}, {pipeline_mode = #tpu.pipeline_mode<synchronous>, transform_indices = @transform_4, window_bounds = array<i64: 1, 16>}, {pipeline_mode = #tpu.pipeline_mode<synchronous>, transform_indices = @transform_5, window_bounds = array<i64: 1, 16>}, {pipeline_mode = #tpu.pipeline_mode<synchronous>, transform_indices = @transform_6, window_bounds = array<i64: 1, 16>}, {pipeline_mode = #tpu.pipeline_mode<synchronous>, transform_indices = @transform_7, window_bounds = array<i64: 1, 16>}, {pipeline_mode = #tpu.pipeline_mode<synchronous>, transform_indices = @transform_8, window_bounds = array<i64: 1, 16>}, {pipeline_mode = #tpu.pipeline_mode<synchronous>, transform_indices = @transform_9, window_bounds = array<i64: 1, 16>}, {pipeline_mode = #tpu.pipeline_mode<synchronous>, transform_indices = @transform_10, window_bounds = array<i64: 1, 16>}, {pipeline_mode = #tpu.pipeline_mode<synchronous>, transform_indices = @transform_11, window_bounds = array<i64: 1, 16>}, {transform_indices = @transform_12, window_bounds = array<i64: 64, 16>}]} {
    %c0 = arith.constant 0 : index
    %c0_0 = arith.constant 0 : index
    %0 = vector.load %arg1[%c0, %c0_0] : memref<64x4xbf16, #tpu.memory_space<vmem>>, vector<64x4xbf16>
    %c0_1 = arith.constant 0 : index
    %c0_2 = arith.constant 0 : index
    %1 = vector.load %arg3[%c0_1, %c0_2] : memref<4x16xbf16, #tpu.memory_space<vmem>>, vector<4x16xbf16>
    %cst = arith.constant dense<0.000000e+00> : vector<64x16xf32>
    %2 = tpu.matmul %0, %1, %cst {dimension_numbers = #tpu.dot_dimension_numbers<[1], [0], [0], [1], [0, 0, 1, 1], [], []>} : vector<64x4xbf16>, vector<4x16xbf16>, vector<64x16xf32> -> vector<64x16xf32>
    %c0_3 = arith.constant 0 : index
    %c0_4 = arith.constant 0 : index
    %3 = vector.load %arg2[%c0_3, %c0_4] : memref<64x4xbf16, #tpu.memory_space<vmem>>, vector<64x4xbf16>
    %c0_5 = arith.constant 0 : index
    %c0_6 = arith.constant 0 : index
    %4 = vector.load %arg4[%c0_5, %c0_6] : memref<4x16xbf16, #tpu.memory_space<vmem>>, vector<4x16xbf16>
    %cst_7 = arith.constant dense<0.000000e+00> : vector<64x16xf32>
    %5 = tpu.matmul %3, %4, %cst_7 {dimension_numbers = #tpu.dot_dimension_numbers<[1], [0], [0], [1], [0, 0, 1, 1], [], []>} : vector<64x4xbf16>, vector<4x16xbf16>, vector<64x16xf32> -> vector<64x16xf32>
    %c0_8 = arith.constant 0 : index
    %c0_9 = arith.constant 0 : index
    %6 = vector.load %arg5[%c0_8, %c0_9] : memref<1x16xf32, #tpu.memory_space<vmem>>, vector<1x16xf32>
    %c0_10 = arith.constant 0 : index
    %c0_11 = arith.constant 0 : index
    %7 = vector.load %arg6[%c0_10, %c0_11] : memref<1x16xf32, #tpu.memory_space<vmem>>, vector<1x16xf32>
    %c0_12 = arith.constant 0 : index
    %c0_13 = arith.constant 0 : index
    %8 = vector.load %arg9[%c0_12, %c0_13] : memref<1x16xf32, #tpu.memory_space<vmem>>, vector<1x16xf32>
    %c0_14 = arith.constant 0 : index
    %c0_15 = arith.constant 0 : index
    %9 = vector.load %arg10[%c0_14, %c0_15] : memref<1x16xf32, #tpu.memory_space<vmem>>, vector<1x16xf32>
    %cst_16 = arith.constant 7.812500e-03 : f32
    %10 = vector.broadcast %cst_16 : f32 to vector<1x16xf32>
    %11 = arith.mulf %6, %10 : vector<1x16xf32>
    %cst_17 = arith.constant 7.812500e-03 : f32
    %12 = vector.broadcast %cst_17 : f32 to vector<1x16xf32>
    %13 = arith.mulf %7, %12 : vector<1x16xf32>
    %14 = arith.mulf %11, %11 : vector<1x16xf32>
    %15 = arith.subf %13, %14 : vector<1x16xf32>
    %cst_18 = arith.constant 9.99999974E-6 : f32
    %16 = vector.broadcast %cst_18 : f32 to vector<1x16xf32>
    %17 = arith.addf %15, %16 : vector<1x16xf32>
    %18 = math.rsqrt %17 : vector<1x16xf32>
    %19 = arith.mulf %8, %18 : vector<1x16xf32>
    %20 = arith.mulf %11, %19 : vector<1x16xf32>
    %21 = arith.subf %9, %20 : vector<1x16xf32>
    %c0_19 = arith.constant 0 : index
    %c0_20 = arith.constant 0 : index
    %22 = vector.load %arg7[%c0_19, %c0_20] : memref<1x16xf32, #tpu.memory_space<vmem>>, vector<1x16xf32>
    %c0_21 = arith.constant 0 : index
    %c0_22 = arith.constant 0 : index
    %23 = vector.load %arg8[%c0_21, %c0_22] : memref<1x16xf32, #tpu.memory_space<vmem>>, vector<1x16xf32>
    %c0_23 = arith.constant 0 : index
    %c0_24 = arith.constant 0 : index
    %24 = vector.load %arg11[%c0_23, %c0_24] : memref<1x16xf32, #tpu.memory_space<vmem>>, vector<1x16xf32>
    %c0_25 = arith.constant 0 : index
    %c0_26 = arith.constant 0 : index
    %25 = vector.load %arg12[%c0_25, %c0_26] : memref<1x16xf32, #tpu.memory_space<vmem>>, vector<1x16xf32>
    %cst_27 = arith.constant 7.812500e-03 : f32
    %26 = vector.broadcast %cst_27 : f32 to vector<1x16xf32>
    %27 = arith.mulf %22, %26 : vector<1x16xf32>
    %cst_28 = arith.constant 7.812500e-03 : f32
    %28 = vector.broadcast %cst_28 : f32 to vector<1x16xf32>
    %29 = arith.mulf %23, %28 : vector<1x16xf32>
    %30 = arith.mulf %27, %27 : vector<1x16xf32>
    %31 = arith.subf %29, %30 : vector<1x16xf32>
    %cst_29 = arith.constant 9.99999974E-6 : f32
    %32 = vector.broadcast %cst_29 : f32 to vector<1x16xf32>
    %33 = arith.addf %31, %32 : vector<1x16xf32>
    %34 = math.rsqrt %33 : vector<1x16xf32>
    %35 = arith.mulf %24, %34 : vector<1x16xf32>
    %36 = arith.mulf %27, %35 : vector<1x16xf32>
    %37 = arith.subf %25, %36 : vector<1x16xf32>
    %38 = vector.broadcast %19 : vector<1x16xf32> to vector<64x16xf32>
    %39 = arith.mulf %2, %38 : vector<64x16xf32>
    %40 = vector.broadcast %21 : vector<1x16xf32> to vector<64x16xf32>
    %41 = arith.addf %39, %40 : vector<64x16xf32>
    %42 = vector.broadcast %35 : vector<1x16xf32> to vector<64x16xf32>
    %43 = arith.mulf %5, %42 : vector<64x16xf32>
    %44 = vector.broadcast %37 : vector<1x16xf32> to vector<64x16xf32>
    %45 = arith.addf %43, %44 : vector<64x16xf32>
    %46 = arith.addf %41, %45 : vector<64x16xf32>
    %cst_30 = arith.constant 0.000000e+00 : f32
    %47 = vector.broadcast %cst_30 : f32 to vector<64x16xf32>
    %48 = arith.maximumf %46, %47 : vector<64x16xf32>
    %c0_31 = arith.constant 0 : index
    %c0_32 = arith.constant 0 : index
    %49 = vector.load %arg13[%c0_31, %c0_32] : memref<64x16xf32, #tpu.memory_space<vmem>>, vector<64x16xf32>
    tpu.vector_store %arg13[%c0_31, %c0_32], %48 {strides = array<i32>} : memref<64x16xf32, #tpu.memory_space<vmem>>, vector<64x16xf32>,
    return
  }
  func.func @transform_0(%arg0: i32) -> (i32, i32) {
    %c0_i32 = arith.constant 0 : i32
    %c0_i32_0 = arith.constant 0 : i32
    return %arg0, %c0_i32 : i32, i32
  }
  func.func @transform_1(%arg0: i32) -> (i32, i32) {
    %c0_i32 = arith.constant 0 : i32
    %c0_i32_0 = arith.constant 0 : i32
    return %arg0, %c0_i32 : i32, i32
  }
  func.func @transform_2(%arg0: i32) -> (i32, i32) {
    %c0_i32 = arith.constant 0 : i32
    %c0_i32_0 = arith.constant 0 : i32
    %c0_i32_1 = arith.constant 0 : i32
    return %c0_i32, %c0_i32_0 : i32, i32
  }
  func.func @transform_3(%arg0: i32) -> (i32, i32) {
    %c0_i32 = arith.constant 0 : i32
    %c0_i32_0 = arith.constant 0 : i32
    %c0_i32_1 = arith.constant 0 : i32
    return %c0_i32, %c0_i32_0 : i32, i32
  }
  func.func @transform_4(%arg0: i32) -> (i32, i32) {
    %c0_i32 = arith.constant 0 : i32
    %c0_i32_0 = arith.constant 0 : i32
    %c0_i32_1 = arith.constant 0 : i32
    return %c0_i32, %c0_i32_0 : i32, i32
  }
  func.func @transform_5(%arg0: i32) -> (i32, i32) {
    %c0_i32 = arith.constant 0 : i32
    %c0_i32_0 = arith.constant 0 : i32
    %c0_i32_1 = arith.constant 0 : i32
    return %c0_i32, %c0_i32_0 : i32, i32
  }
  func.func @transform_6(%arg0: i32) -> (i32, i32) {
    %c0_i32 = arith.constant 0 : i32
    %c0_i32_0 = arith.constant 0 : i32
    %c0_i32_1 = arith.constant 0 : i32
    return %c0_i32, %c0_i32_0 : i32, i32
  }
  func.func @transform_7(%arg0: i32) -> (i32, i32) {
    %c0_i32 = arith.constant 0 : i32
    %c0_i32_0 = arith.constant 0 : i32
    %c0_i32_1 = arith.constant 0 : i32
    return %c0_i32, %c0_i32_0 : i32, i32
  }
  func.func @transform_8(%arg0: i32) -> (i32, i32) {
    %c0_i32 = arith.constant 0 : i32
    %c0_i32_0 = arith.constant 0 : i32
    %c0_i32_1 = arith.constant 0 : i32
    return %c0_i32, %c0_i32_0 : i32, i32
  }
  func.func @transform_9(%arg0: i32) -> (i32, i32) {
    %c0_i32 = arith.constant 0 : i32
    %c0_i32_0 = arith.constant 0 : i32
    %c0_i32_1 = arith.constant 0 : i32
    return %c0_i32, %c0_i32_0 : i32, i32
  }
  func.func @transform_10(%arg0: i32) -> (i32, i32) {
    %c0_i32 = arith.constant 0 : i32
    %c0_i32_0 = arith.constant 0 : i32
    %c0_i32_1 = arith.constant 0 : i32
    return %c0_i32, %c0_i32_0 : i32, i32
  }
  func.func @transform_11(%arg0: i32) -> (i32, i32) {
    %c0_i32 = arith.constant 0 : i32
    %c0_i32_0 = arith.constant 0 : i32
    %c0_i32_1 = arith.constant 0 : i32
    return %c0_i32, %c0_i32_0 : i32, i32
  }
  func.func @transform_12(%arg0: i32) -> (i32, i32) {
    %c0_i32 = arith.constant 0 : i32
    %c0_i32_0 = arith.constant 0 : i32
    return %arg0, %c0_i32 : i32, i32
  }
}

module attributes {stable_mosaic.version = 11 : i64} {
  func.func @_proj_stats_kernel(%arg0: i32, %arg1: memref<64x4xbf16, #tpu.memory_space<vmem>>, %arg2: memref<64x4xbf16, #tpu.memory_space<vmem>>, %arg3: memref<4x16xbf16, #tpu.memory_space<vmem>>, %arg4: memref<4x16xbf16, #tpu.memory_space<vmem>>, %arg5: memref<1x16xf32, #tpu.memory_space<vmem>>, %arg6: memref<1x16xf32, #tpu.memory_space<vmem>>, %arg7: memref<1x16xf32, #tpu.memory_space<vmem>>, %arg8: memref<1x16xf32, #tpu.memory_space<vmem>>) attributes {dimension_semantics = [#tpu.dimension_semantics<arbitrary>], iteration_bounds = array<i64: 2>, scalar_prefetch = 0 : i64, scratch_operands = 0 : i64, tpu.core_type = #tpu.core_type<tc>, window_params = [{transform_indices = @transform_0, window_bounds = array<i64: 64, 4>}, {transform_indices = @transform_1, window_bounds = array<i64: 64, 4>}, {pipeline_mode = #tpu.pipeline_mode<synchronous>, transform_indices = @transform_2, window_bounds = array<i64: 4, 16>}, {pipeline_mode = #tpu.pipeline_mode<synchronous>, transform_indices = @transform_3, window_bounds = array<i64: 4, 16>}, {pipeline_mode = #tpu.pipeline_mode<synchronous>, transform_indices = @transform_4, window_bounds = array<i64: 1, 16>}, {pipeline_mode = #tpu.pipeline_mode<synchronous>, transform_indices = @transform_5, window_bounds = array<i64: 1, 16>}, {pipeline_mode = #tpu.pipeline_mode<synchronous>, transform_indices = @transform_6, window_bounds = array<i64: 1, 16>}, {pipeline_mode = #tpu.pipeline_mode<synchronous>, transform_indices = @transform_7, window_bounds = array<i64: 1, 16>}]} {
    %c0_i32 = arith.constant 0 : i32
    %0 = arith.cmpi eq, %arg0, %c0_i32 : i32
    %1 = arith.extui %0 : i1 to i32
    %c0_i32_0 = arith.constant 0 : i32
    %2 = arith.cmpi ne, %1, %c0_i32_0 : i32
    scf.if %2 {
      %cst_29 = arith.constant 0.000000e+00 : f32
      %31 = vector.broadcast %cst_29 : f32 to vector<1x16xf32>
      %c0_30 = arith.constant 0 : index
      %c0_31 = arith.constant 0 : index
      %32 = vector.load %arg5[%c0_30, %c0_31] : memref<1x16xf32, #tpu.memory_space<vmem>>, vector<1x16xf32>
      tpu.vector_store %arg5[%c0_30, %c0_31], %31 {strides = array<i32>} : memref<1x16xf32, #tpu.memory_space<vmem>>, vector<1x16xf32>,
      %cst_32 = arith.constant 0.000000e+00 : f32
      %33 = vector.broadcast %cst_32 : f32 to vector<1x16xf32>
      %c0_33 = arith.constant 0 : index
      %c0_34 = arith.constant 0 : index
      %34 = vector.load %arg6[%c0_33, %c0_34] : memref<1x16xf32, #tpu.memory_space<vmem>>, vector<1x16xf32>
      tpu.vector_store %arg6[%c0_33, %c0_34], %33 {strides = array<i32>} : memref<1x16xf32, #tpu.memory_space<vmem>>, vector<1x16xf32>,
      %cst_35 = arith.constant 0.000000e+00 : f32
      %35 = vector.broadcast %cst_35 : f32 to vector<1x16xf32>
      %c0_36 = arith.constant 0 : index
      %c0_37 = arith.constant 0 : index
      %36 = vector.load %arg7[%c0_36, %c0_37] : memref<1x16xf32, #tpu.memory_space<vmem>>, vector<1x16xf32>
      tpu.vector_store %arg7[%c0_36, %c0_37], %35 {strides = array<i32>} : memref<1x16xf32, #tpu.memory_space<vmem>>, vector<1x16xf32>,
      %cst_38 = arith.constant 0.000000e+00 : f32
      %37 = vector.broadcast %cst_38 : f32 to vector<1x16xf32>
      %c0_39 = arith.constant 0 : index
      %c0_40 = arith.constant 0 : index
      %38 = vector.load %arg8[%c0_39, %c0_40] : memref<1x16xf32, #tpu.memory_space<vmem>>, vector<1x16xf32>
      tpu.vector_store %arg8[%c0_39, %c0_40], %37 {strides = array<i32>} : memref<1x16xf32, #tpu.memory_space<vmem>>, vector<1x16xf32>,
    } else {
    }
    %c0 = arith.constant 0 : index
    %c0_1 = arith.constant 0 : index
    %3 = vector.load %arg1[%c0, %c0_1] : memref<64x4xbf16, #tpu.memory_space<vmem>>, vector<64x4xbf16>
    %c0_2 = arith.constant 0 : index
    %c0_3 = arith.constant 0 : index
    %4 = vector.load %arg3[%c0_2, %c0_3] : memref<4x16xbf16, #tpu.memory_space<vmem>>, vector<4x16xbf16>
    %cst = arith.constant dense<0.000000e+00> : vector<64x16xf32>
    %5 = tpu.matmul %3, %4, %cst {dimension_numbers = #tpu.dot_dimension_numbers<[1], [0], [0], [1], [0, 0, 1, 1], [], []>} : vector<64x4xbf16>, vector<4x16xbf16>, vector<64x16xf32> -> vector<64x16xf32>
    %c0_4 = arith.constant 0 : index
    %c0_5 = arith.constant 0 : index
    %6 = vector.load %arg2[%c0_4, %c0_5] : memref<64x4xbf16, #tpu.memory_space<vmem>>, vector<64x4xbf16>
    %c0_6 = arith.constant 0 : index
    %c0_7 = arith.constant 0 : index
    %7 = vector.load %arg4[%c0_6, %c0_7] : memref<4x16xbf16, #tpu.memory_space<vmem>>, vector<4x16xbf16>
    %cst_8 = arith.constant dense<0.000000e+00> : vector<64x16xf32>
    %8 = tpu.matmul %6, %7, %cst_8 {dimension_numbers = #tpu.dot_dimension_numbers<[1], [0], [0], [1], [0, 0, 1, 1], [], []>} : vector<64x4xbf16>, vector<4x16xbf16>, vector<64x16xf32> -> vector<64x16xf32>
    %c0_9 = arith.constant 0 : index
    %c0_10 = arith.constant 0 : index
    %9 = vector.load %arg5[%c0_9, %c0_10] : memref<1x16xf32, #tpu.memory_space<vmem>>, vector<1x16xf32>
    %cst_11 = arith.constant dense<0.000000e+00> : vector<16xf32>
    %10 = vector.multi_reduction <add>, %5, %cst_11 [0] : vector<64x16xf32> to vector<16xf32>
    %11 = vector.shape_cast %10 : vector<16xf32> to vector<1x16xf32>
    %12 = arith.addf %9, %11 : vector<1x16xf32>
    %c0_12 = arith.constant 0 : index
    %c0_13 = arith.constant 0 : index
    %13 = vector.load %arg5[%c0_12, %c0_13] : memref<1x16xf32, #tpu.memory_space<vmem>>, vector<1x16xf32>
    tpu.vector_store %arg5[%c0_12, %c0_13], %12 {strides = array<i32>} : memref<1x16xf32, #tpu.memory_space<vmem>>, vector<1x16xf32>,
    %c0_14 = arith.constant 0 : index
    %c0_15 = arith.constant 0 : index
    %14 = vector.load %arg6[%c0_14, %c0_15] : memref<1x16xf32, #tpu.memory_space<vmem>>, vector<1x16xf32>
    %15 = arith.mulf %5, %5 : vector<64x16xf32>
    %cst_16 = arith.constant dense<0.000000e+00> : vector<16xf32>
    %16 = vector.multi_reduction <add>, %15, %cst_16 [0] : vector<64x16xf32> to vector<16xf32>
    %17 = vector.shape_cast %16 : vector<16xf32> to vector<1x16xf32>
    %18 = arith.addf %14, %17 : vector<1x16xf32>
    %c0_17 = arith.constant 0 : index
    %c0_18 = arith.constant 0 : index
    %19 = vector.load %arg6[%c0_17, %c0_18] : memref<1x16xf32, #tpu.memory_space<vmem>>, vector<1x16xf32>
    tpu.vector_store %arg6[%c0_17, %c0_18], %18 {strides = array<i32>} : memref<1x16xf32, #tpu.memory_space<vmem>>, vector<1x16xf32>,
    %c0_19 = arith.constant 0 : index
    %c0_20 = arith.constant 0 : index
    %20 = vector.load %arg7[%c0_19, %c0_20] : memref<1x16xf32, #tpu.memory_space<vmem>>, vector<1x16xf32>
    %cst_21 = arith.constant dense<0.000000e+00> : vector<16xf32>
    %21 = vector.multi_reduction <add>, %8, %cst_21 [0] : vector<64x16xf32> to vector<16xf32>
    %22 = vector.shape_cast %21 : vector<16xf32> to vector<1x16xf32>
    %23 = arith.addf %20, %22 : vector<1x16xf32>
    %c0_22 = arith.constant 0 : index
    %c0_23 = arith.constant 0 : index
    %24 = vector.load %arg7[%c0_22, %c0_23] : memref<1x16xf32, #tpu.memory_space<vmem>>, vector<1x16xf32>
    tpu.vector_store %arg7[%c0_22, %c0_23], %23 {strides = array<i32>} : memref<1x16xf32, #tpu.memory_space<vmem>>, vector<1x16xf32>,
    %c0_24 = arith.constant 0 : index
    %c0_25 = arith.constant 0 : index
    %25 = vector.load %arg8[%c0_24, %c0_25] : memref<1x16xf32, #tpu.memory_space<vmem>>, vector<1x16xf32>
    %26 = arith.mulf %8, %8 : vector<64x16xf32>
    %cst_26 = arith.constant dense<0.000000e+00> : vector<16xf32>
    %27 = vector.multi_reduction <add>, %26, %cst_26 [0] : vector<64x16xf32> to vector<16xf32>
    %28 = vector.shape_cast %27 : vector<16xf32> to vector<1x16xf32>
    %29 = arith.addf %25, %28 : vector<1x16xf32>
    %c0_27 = arith.constant 0 : index
    %c0_28 = arith.constant 0 : index
    %30 = vector.load %arg8[%c0_27, %c0_28] : memref<1x16xf32, #tpu.memory_space<vmem>>, vector<1x16xf32>
    tpu.vector_store %arg8[%c0_27, %c0_28], %29 {strides = array<i32>} : memref<1x16xf32, #tpu.memory_space<vmem>>, vector<1x16xf32>,
    return
  }
  func.func @transform_0(%arg0: i32) -> (i32, i32) {
    %c0_i32 = arith.constant 0 : i32
    %c0_i32_0 = arith.constant 0 : i32
    return %arg0, %c0_i32 : i32, i32
  }
  func.func @transform_1(%arg0: i32) -> (i32, i32) {
    %c0_i32 = arith.constant 0 : i32
    %c0_i32_0 = arith.constant 0 : i32
    return %arg0, %c0_i32 : i32, i32
  }
  func.func @transform_2(%arg0: i32) -> (i32, i32) {
    %c0_i32 = arith.constant 0 : i32
    %c0_i32_0 = arith.constant 0 : i32
    %c0_i32_1 = arith.constant 0 : i32
    return %c0_i32, %c0_i32_0 : i32, i32
  }
  func.func @transform_3(%arg0: i32) -> (i32, i32) {
    %c0_i32 = arith.constant 0 : i32
    %c0_i32_0 = arith.constant 0 : i32
    %c0_i32_1 = arith.constant 0 : i32
    return %c0_i32, %c0_i32_0 : i32, i32
  }
  func.func @transform_4(%arg0: i32) -> (i32, i32) {
    %c0_i32 = arith.constant 0 : i32
    %c0_i32_0 = arith.constant 0 : i32
    %c0_i32_1 = arith.constant 0 : i32
    return %c0_i32, %c0_i32_0 : i32, i32
  }
  func.func @transform_5(%arg0: i32) -> (i32, i32) {
    %c0_i32 = arith.constant 0 : i32
    %c0_i32_0 = arith.constant 0 : i32
    %c0_i32_1 = arith.constant 0 : i32
    return %c0_i32, %c0_i32_0 : i32, i32
  }
  func.func @transform_6(%arg0: i32) -> (i32, i32) {
    %c0_i32 = arith.constant 0 : i32
    %c0_i32_0 = arith.constant 0 : i32
    %c0_i32_1 = arith.constant 0 : i32
    return %c0_i32, %c0_i32_0 : i32, i32
  }
  func.func @transform_7(%arg0: i32) -> (i32, i32) {
    %c0_i32 = arith.constant 0 : i32
    %c0_i32_0 = arith.constant 0 : i32
    %c0_i32_1 = arith.constant 0 : i32
    return %c0_i32, %c0_i32_0 : i32, i32
  }
}

</mosaic_0001>

<bundles_post_ra>
// kernel: bottleneck_forward.6
= control target key start
LH: loop header
LB: loop body
LE: loop exit
PB: predicated region body
PF: predicated region fallthrough
CT: control target
= control target key end

     0   :  { %s404_s12 = smov 0   ;;  %s459_s0 = inlined_call_operand.vmem [shape: bf16[512,4], index: 0, kind: input, shape index: {}]   ;;  %s460_s1 = inlined_call_operand.vmem [shape: bf16[4,4], index: 1, kind: input, shape index: {}]   ;;  %s461_s2 = inlined_call_operand.vmem [shape: f32[1,4], index: 2, kind: output, shape index: {0}]   ;;  %s462_s3 = inlined_call_operand.vmem [shape: f32[1,4], index: 3, kind: output, shape index: {1}]  }
   0x1 LB: > { %s330_s13 = sadd.s32 4294967295, %s381_s12   ;;  %p333_p0 = scmp.ge.s32.totalorder %s381_s12, 1  ;;  %s381_s12 = sphi %s404_s12, %s14_s12  }
   0x2   : > { %p131_p1 = scmp.lt.s32.totalorder %s381_s12, 9 }
   0x4   : > { %p132_p2 = pnand %p333_p0, %p131_p1 }
   0x5   : > { %s334_s14 = sshll.u32 (!%p132_p2), %s330_s13, 3  ;;  %p336_p4 = scmp.ne.s32.totalorder (!%p132_p2), %s330_s13, 0 }
   0x6   : > { %135 = sbr.rel (%p132_p2) target bundleno = 190 (0xbe), region = 28  ;;  %p151_p3 = scmp.lt.s32.totalorder (!%p132_p2), %s334_s14, 63 }
   0xb   : > { %s464_s14 = smov (!%p151_p3, %s334_s14), 63  ;;  %160 = sbr.rel (%p336_p4) target bundleno = 19 (0x13), region = 32 }
   0xc   : > { %s335_s15 = sshll.u32 %s464_s14, 2 }
   0xd   : > { %s154_s18 = scalar_lea.vmem %s459_s0, %s335_s15 }
  0x10   : > { %vm161_vm0 = vcmask 24576   ;;  %v383_v0 = vmov 0.0  }
  0x11   : > { %162 = vst.msk [vmem:[%s461_s2] sm:$0x1] %vm161_vm0, %v383_v0 }
  0x12   : > { %163 = vst.msk [vmem:[%s462_s3] sm:$0x1] %vm161_vm0, %v383_v0 }
  0x13 PF: > { %v172_v1 = vld [vmem:[%s460_s1] sm:$0x3]  ;;  %vm206_vm1 = vcmask 1041408   ;;  %v360_v4 = vld [vmem:[%s154_s18 + $0x8] sm:$0xff]  ;;  %vm193_vm2 = vcmask 31744   ;;  %v361_v5 = vld [vmem:[%s154_s18 + $0x10] sm:$0xff] }
  0x14   : > { %v208_v2 = vsel %vm206_vm1, %v172_v1, 0  ;;  %v359_v3 = vld [vmem:[%s154_s18] sm:$0xff]  ;;  %v362_v6 = vld [vmem:[%s154_s18 + $0x18] sm:$0xff]  ;;  %vm262_vm3 = vcmask 24576  }
  0x15   : > { %217 = vmatpush.bf16.msra.mxu0 %v208_v2  ;;  %363 = vmatpush.bf16.msra.mxu1 %v208_v2 }
  0x16   : > { %364 = vmatpush.bf16.msra.mxu2 %v208_v2  ;;  %365 = vmatpush.bf16.msra.mxu3 %v208_v2 }
  0x18   : > { %353 = vmatmul.msk.bf16.vlgmr.msra.gmra.mxu0 %vm193_vm2, %v359_v3  ;;  %354 = vmatmul.msk.bf16.vlgmr.msra.gmra.mxu1 %vm193_vm2, %v360_v4  ;;  %v239_v62 = vld [vmem:[%s461_s2] sm:$0x1] }
  0x19   : > { %355 = vmatmul.msk.bf16.vlgmr.msra.gmra.mxu2 %vm193_vm2, %v361_v5  ;;  %356 = vmatmul.msk.bf16.vlgmr.msra.gmra.mxu3 %vm193_vm2, %v362_v6  ;;  %v264_v1 = vld [vmem:[%s462_s3] sm:$0x1] }
  0x95   : > { %v219_v7 = vpop.f32.mrf.mxu0  ;;  %v224_v8 = vpop.f32.mrf.mxu1 }
  0x96   : > { %v265_v9 = vmul.f32 %v219_v7, %v219_v7  ;;  %v240_v14 = vsel %vm193_vm2, %v219_v7, 0.0  ;;  %v267_v15 = vmul.f32 %v224_v8, %v224_v8  ;;  %v243_v20 = vsel %vm193_vm2, %v224_v8, 0.0 }
  0x98   : > { %v273_v19 = vsel %vm193_vm2, %v265_v9, 0.0  ;;  %v276_v25 = vsel %vm193_vm2, %v267_v15, 0.0 }
  0x9c   : > { %v229_v10 = vpop.f32.mrf.mxu2  ;;  %v234_v11 = vpop.f32.mrf.mxu3 }
  0x9d   : > { %v221_v12 = vpop.f32.mrf.mxu0  ;;  %v226_v13 = vpop.f32.mrf.mxu1  ;;  %v269_v26 = vmul.f32 %v229_v10, %v229_v10  ;;  %v247_v30 = vsel %vm193_vm2, %v229_v10, 0.0  ;;  %v271_v38 = vmul.f32 %v234_v11, %v234_v11  ;;  %v251_v42 = vsel %vm193_vm2, %v234_v11, 0.0 }
  0x9e   : > { %v241_v16 = vsel %vm193_vm2, %v221_v12, 0.0  ;;  %v266_v17 = vmul.f32 %v221_v12, %v221_v12  ;;  %v268_v22 = vmul.f32 %v226_v13, %v226_v13  ;;  %v245_v27 = vsel %vm193_vm2, %v226_v13, 0.0 }
  0x9f   : > { %v242_v18 = vadd.f32 %v241_v16, %v240_v14  ;;  %v280_v37 = vsel %vm193_vm2, %v269_v26, 0.0  ;;  %v284_v47 = vsel %vm193_vm2, %v271_v38, 0.0 }
  0xa0   : > { %v274_v21 = vsel %vm193_vm2, %v266_v17, 0.0  ;;  %v278_v31 = vsel %vm193_vm2, %v268_v22, 0.0 }
  0xa1   : > { %v275_v23 = vadd.f32 %v274_v21, %v273_v19  ;;  %v244_v24 = vadd.f32 %v243_v20, %v242_v18 }
  0xa3   : > { %v246_v28 = vadd.f32 %v245_v27, %v244_v24  ;;  %v277_v29 = vadd.f32 %v276_v25, %v275_v23 }
  0xa4   : > { %v231_v32 = vpop.f32.mrf.mxu2  ;;  %v236_v36 = vpop.f32.mrf.mxu3 }
  0xa5   : > { %v279_v33 = vadd.f32 %v278_v31, %v277_v29  ;;  %v248_v34 = vadd.f32 %v247_v30, %v246_v28  ;;  %v270_v35 = vmul.f32 %v231_v32, %v231_v32  ;;  %v249_v39 = vsel %vm193_vm2, %v231_v32, 0.0 }
  0xa6   : > { %v272_v44 = vmul.f32 %v236_v36, %v236_v36  ;;  %v253_v48 = vsel %vm193_vm2, %v236_v36, 0.0 }
  0xa7   : > { %v250_v40 = vadd.f32 %v249_v39, %v248_v34  ;;  %v281_v41 = vadd.f32 %v280_v37, %v279_v33  ;;  %v282_v43 = vsel %vm193_vm2, %v270_v35, 0.0 }
  0xa8   : > { %v286_v51 = vsel %vm193_vm2, %v272_v44, 0.0 }
  0xa9   : > { %v283_v45 = vadd.f32 %v282_v43, %v281_v41  ;;  %v252_v46 = vadd.f32 %v251_v42, %v250_v40 }
  0xab   : > { %v254_v49 = vadd.f32 %v253_v48, %v252_v46  ;;  %v285_v50 = vadd.f32 %v284_v47, %v283_v45 }
  0xad   : > { %v255_v52 = vrot.slane %v254_v49, 4  ;;  %v287_v53 = vadd.f32 %v286_v51, %v285_v50 }
  0xaf   : > { %v256_v54 = vadd.f32 %v255_v52, %v254_v49  ;;  %v288_v55 = vrot.slane %v287_v53, 4 }
  0xb1   : > { %v257_v56 = vrot.slane %v256_v54, 2  ;;  %v289_v57 = vadd.f32 %v288_v55, %v287_v53 }
  0xb3   : > { %v258_v58 = vadd.f32 %v257_v56, %v256_v54  ;;  %v290_v59 = vrot.slane %v289_v57, 2 }
  0xb5   : > { %v259_v60 = vrot.slane %v258_v58, 1  ;;  %v291_v61 = vadd.f32 %v290_v59, %v289_v57 }
  0xb7   : > { %v260_v63 = vadd.f32 %v259_v60, %v258_v58  ;;  %v292_v0 = vrot.slane %v291_v61, 1 }
  0xb9   : > { %v261_v2 = vadd.f32 %v260_v63, %v239_v62  ;;  %v293_v3 = vadd.f32 %v292_v0, %v291_v61 }
  0xbb   : > { %263 = vst.msk [vmem:[%s461_s2] sm:$0x1] %vm262_vm3, %v261_v2  ;;  %v294_v4 = vadd.f32 %v293_v3, %v264_v1 }
  0xbd   : > { %295 = vst.msk [vmem:[%s462_s3] sm:$0x1] %vm262_vm3, %v294_v4 }
  0xbe PF: > { %s14_s12 = sadd.s32 1, %s381_s12  }
  0xbf   : > { %p11_p5 = scmp.ge.s32.totalorder %s14_s12, 10  }
  0xc1   :  { %13 = sbr.rel (!%p11_p5) target bundleno = 1 (0x1), region = 66 }

// kernel: bottleneck_forward.7
= control target key start
LH: loop header
LB: loop body
LE: loop exit
PB: predicated region body
PF: predicated region fallthrough
CT: control target
= control target key end

     0   :  { %s547_s21 = smov 0   ;;  %s604_s0 = inlined_call_operand.vmem [shape: bf16[512,4], index: 0, kind: input, shape index: {}]   ;;  %s605_s1 = inlined_call_operand.vmem [shape: bf16[4,4], index: 1, kind: input, shape index: {}]   ;;  %s606_s2 = inlined_call_operand.vmem [shape: f32[1,4], index: 2, kind: input, shape index: {}]   ;;  %s607_s3 = inlined_call_operand.vmem [shape: f32[1,4], index: 3, kind: input, shape index: {}]   ;;  %s608_s4 = inlined_call_operand.vmem [shape: f32[1,4], index: 4, kind: input, shape index: {}]   ;;  %s609_s5 = inlined_call_operand.vmem [shape: f32[1,4], index: 5, kind: input, shape index: {}]   ;;  %s610_s6 = inlined_call_operand.vmem [shape: bf16[512,4], index: 6, kind: output, shape index: {}]  }
   0x1 LB: > { %s456_s22 = sadd.s32 4294967295, %s510_s21   ;;  %p460_p0 = scmp.ge.s32.totalorder %s510_s21, 1  ;;  %s510_s21 = sphi %s547_s21, %s16_s21  }
   0x2   : > { %p213_p1 = scmp.lt.s32.totalorder %s510_s21, 9 }
   0x4   : > { %p214_p2 = pnand %p460_p0, %p213_p1 }
   0x5   : > { %s461_s25 = sshll.u32 (!%p214_p2), %s456_s22, 3 }
   0x6   : > { %217 = sbr.rel (%p214_p2) target bundleno = 167 (0xa7), region = 44  ;;  %p244_p3 = scmp.lt.s32.totalorder (!%p214_p2), %s461_s25, 63 }
   0xb   : > { %v264_v0 = vld [vmem:[%s605_s1] sm:$0x3]  ;;  %vm298_vm0 = vcmask 1041408   ;;  %s612_s25 = smov (!%p244_p3, %s461_s25), 63  ;;  %vm285_vm1 = vcmask 31744   ;;  %vm391_vm5 = vcmask 27648  }
   0xc   : > { %v300_v1 = vsel %vm298_vm0, %v264_v0, 0  ;;  %s462_s26 = sshll.u32 %s612_s25, 2  ;;  %v331_v6 = vld [vmem:[%s606_s2] sm:$0x1] }
   0xd   : > { %309 = vmatpush.bf16.msra.mxu0 %v300_v1  ;;  %491 = vmatpush.bf16.msra.mxu1 %v300_v1  ;;  %s247_s29 = scalar_lea.vmem %s604_s0, %s462_s26  ;;  %v335_v7 = vmul.f32 0.001953125, %v331_v6  ;;  %v332_v8 = vld [vmem:[%s607_s3] sm:$0x1]  ;;  %s583_s16 = scalar_lea.vmem %s610_s6, %s462_s26 }
   0xe   : > { %492 = vmatpush.bf16.msra.mxu2 %v300_v1  ;;  %493 = vmatpush.bf16.msra.mxu3 %v300_v1  ;;  %v487_v2 = vld [vmem:[%s247_s29] sm:$0xff]  ;;  %v488_v3 = vld [vmem:[%s247_s29 + $0x8] sm:$0xff]  ;;  %v489_v4 = vld [vmem:[%s247_s29 + $0x10] sm:$0xff]  ;;  %v336_v9 = vmul.f32 0.001953125, %v332_v8 }
   0xf   : > { %v490_v5 = vld [vmem:[%s247_s29 + $0x18] sm:$0xff]  ;;  %v337_v10 = vmul.f32 %v335_v7, %v335_v7  ;;  %v333_v19 = vld [vmem:[%s608_s4] sm:$0x1] }
  0x10   : > { %481 = vmatmul.msk.bf16.vlgmr.msra.gmra.mxu0 %vm285_vm1, %v487_v2  ;;  %482 = vmatmul.msk.bf16.vlgmr.msra.gmra.mxu1 %vm285_vm1, %v488_v3  ;;  %v334_v23 = vld [vmem:[%s609_s5] sm:$0x1] }
  0x11   : > { %483 = vmatmul.msk.bf16.vlgmr.msra.gmra.mxu2 %vm285_vm1, %v489_v4  ;;  %484 = vmatmul.msk.bf16.vlgmr.msra.gmra.mxu3 %vm285_vm1, %v490_v5  ;;  %v338_v11 = vsub.f32 %v336_v9, %v337_v10 }
  0x13   : > { %v339_v12 = vadd.f32 1e-05, %v338_v11 }
  0x15   : > { %502 = vrsqrt.f32 %v339_v12  ;;  %vm346_vm2 = vweird.f32 %v339_v12 }
  0x1b   : > { %v503_v13 = vpop.eup %502 }
  0x1c   : > { %v341_v14 = vmul.f32 %v503_v13, %v339_v12  ;;  %vm347_vm3 = vweird.f32 %v503_v13 }
  0x1d   : > { %vm348_vm4 = vmor %vm346_vm2, %vm347_vm3 }
  0x1e   : > { %v342_v15 = vmul.f32 %v503_v13, %v341_v14 }
  0x20   : > { %v343_v16 = vmul.f32 0.5, %v342_v15 }
  0x22   : > { %v344_v17 = vsub.f32 1.5, %v343_v16 }
  0x24   : > { %v345_v18 = vmul.f32 %v503_v13, %v344_v17 }
  0x26   : > { %v349_v20 = vsel %vm348_vm4, %v503_v13, %v345_v18 }
  0x27   : > { %v350_v21 = vmul.f32 %v349_v20, %v333_v19 }
  0x29   : > { %v351_v22 = vmul.f32 %v350_v21, %v335_v7  ;;  %v354_v25 = vperm.slane %v350_v21, 0 }
  0x2b   : > { %v352_v24 = vsub.f32 %v334_v23, %v351_v22 }
  0x2d   : > { %v365_v26 = vperm.slane %v352_v24, 0 }
  0x8d   : > { %v311_v27 = vpop.f32.mrf.mxu0  ;;  %v316_v28 = vpop.f32.mrf.mxu1 }
  0x8e   : > { %v356_v29 = vmul.f32 %v354_v25, %v311_v27  ;;  %v358_v30 = vmul.f32 %v354_v25, %v316_v28 }
  0x90   : > { %v367_v31 = vadd.f32 %v365_v26, %v356_v29  ;;  %v369_v32 = vadd.f32 %v365_v26, %v358_v30 }
  0x92   : > { %v375_v33 = vmax.f32 %v367_v31, 0.0  ;;  %v377_v34 = vmax.f32 %v369_v32, 0.0 }
  0x94   : > { %v383_v35 = vpack.c.bf16 %v375_v33, %v375_v33  ;;  %v385_v36 = vpack.c.bf16 %v377_v34, %v377_v34  ;;  %v321_v37 = vpop.f32.mrf.mxu2  ;;  %v326_v38 = vpop.f32.mrf.mxu3 }
  0x95   : > { %v360_v39 = vmul.f32 %v354_v25, %v321_v37  ;;  %v362_v40 = vmul.f32 %v354_v25, %v326_v38  ;;  %v313_v41 = vpop.f32.mrf.mxu0  ;;  %v318_v42 = vpop.f32.mrf.mxu1 }
  0x96   : > { %392 = vst.msk [vmem:[%s583_s16] sm:$0xf] %vm391_vm5, %v383_v35  ;;  %v357_v43 = vmul.f32 %v354_v25, %v313_v41  ;;  %v359_v44 = vmul.f32 %v354_v25, %v318_v42 }
  0x97   : > { %394 = vst.msk [vmem:[%s583_s16 + $0x8] sm:$0xf] %vm391_vm5, %v385_v36  ;;  %v371_v45 = vadd.f32 %v365_v26, %v360_v39  ;;  %v373_v46 = vadd.f32 %v365_v26, %v362_v40 }
  0x98   : > { %v368_v47 = vadd.f32 %v365_v26, %v357_v43  ;;  %v370_v48 = vadd.f32 %v365_v26, %v359_v44 }
  0x99   : > { %v379_v49 = vmax.f32 %v371_v45, 0.0  ;;  %v381_v50 = vmax.f32 %v373_v46, 0.0 }
  0x9a   : > { %v376_v51 = vmax.f32 %v368_v47, 0.0  ;;  %v378_v52 = vmax.f32 %v370_v48, 0.0 }
  0x9b   : > { %v387_v53 = vpack.c.bf16 %v379_v49, %v379_v49  ;;  %v389_v54 = vpack.c.bf16 %v381_v50, %v381_v50 }
  0x9c   : > { %v384_v55 = vpack.c.bf16 %v376_v51, %v376_v51  ;;  %v386_v56 = vpack.c.bf16 %v378_v52, %v378_v52  ;;  %v323_v57 = vpop.f32.mrf.mxu2  ;;  %v328_v58 = vpop.f32.mrf.mxu3 }
  0x9d   : > { %396 = vst.msk [vmem:[%s583_s16 + $0x10] sm:$0xf] %vm391_vm5, %v387_v53  ;;  %v361_v59 = vmul.f32 %v354_v25, %v323_v57  ;;  %v363_v60 = vmul.f32 %v354_v25, %v328_v58 }
  0x9e   : > { %398 = vst.msk [vmem:[%s583_s16 + $0x18] sm:$0xf] %vm391_vm5, %v389_v54 }
  0x9f   : > { %393 = vst.msk [vmem:[%s583_s16 + $0x4] sm:$0xf] %vm391_vm5, %v384_v55  ;;  %v372_v61 = vadd.f32 %v365_v26, %v361_v59  ;;  %v374_v62 = vadd.f32 %v365_v26, %v363_v60 }
  0xa0   : > { %395 = vst.msk [vmem:[%s583_s16 + $0xc] sm:$0xf] %vm391_vm5, %v386_v56 }
  0xa1   : > { %v380_v63 = vmax.f32 %v372_v61, 0.0  ;;  %v382_v0 = vmax.f32 %v374_v62, 0.0 }
  0xa3   : > { %v388_v1 = vpack.c.bf16 %v380_v63, %v380_v63  ;;  %v390_v2 = vpack.c.bf16 %v382_v0, %v382_v0 }
  0xa5   : > { %397 = vst.msk [vmem:[%s583_s16 + $0x14] sm:$0xf] %vm391_vm5, %v388_v1 }
  0xa6   : > { %399 = vst.msk [vmem:[%s583_s16 + $0x1c] sm:$0xf] %vm391_vm5, %v390_v2 }
  0xa7 PF: > { %s16_s21 = sadd.s32 1, %s510_s21  }
  0xa8   : > { %p13_p4 = scmp.ge.s32.totalorder %s16_s21, 10  }
  0xaa   :  { %15 = sbr.rel (!%p13_p4) target bundleno = 1 (0x1), region = 74 }

// kernel: bottleneck_forward.9
= control target key start
LH: loop header
LB: loop body
LE: loop exit
PB: predicated region body
PF: predicated region fallthrough
CT: control target
= control target key end

     0   :  { %s792_s21 = smov 0   ;;  %s939_s0 = inlined_call_operand.vmem [shape: bf16[8,9,9,4], index: 0, kind: input, shape index: {}]   ;;  %s940_s1 = inlined_call_operand.vmem [shape: bf16[9,4,4], index: 1, kind: input, shape index: {}]   ;;  %s941_s2 = inlined_call_operand.vmem [shape: f32[1,4], index: 2, kind: input, shape index: {}]   ;;  %s942_s3 = inlined_call_operand.vmem [shape: f32[1,4], index: 3, kind: input, shape index: {}]   ;;  %s943_s4 = inlined_call_operand.vmem [shape: f32[1,4], index: 4, kind: input, shape index: {}]   ;;  %s944_s5 = inlined_call_operand.vmem [shape: f32[1,4], index: 5, kind: input, shape index: {}]   ;;  %s945_s6 = inlined_call_operand.vmem [shape: bf16[128,4], index: 6, kind: output, shape index: {}]  }
   0x1 LB: > { %s652_s22 = sadd.s32 4294967295, %s751_s21   ;;  %p656_p0 = scmp.ge.s32.totalorder %s751_s21, 1  ;;  %s751_s21 = sphi %s792_s21, %s16_s21  }
   0x2   : > { %p214_p1 = scmp.lt.s32.totalorder %s751_s21, 3 }
   0x4   : > { %p215_p2 = pnand %p656_p0, %p214_p1 }
   0x5   : > { %s657_s23 = sshll.u32 (!%p215_p2), %s652_s22, 2  ;;  %s659_s24 = sshll.u32 (!%p215_p2), %s652_s22, 3 }
   0x6   : > { %218 = sbr.rel (%p215_p2) target bundleno = 219 (0xdb), region = 44  ;;  %p246_p3 = scmp.lt.s32.totalorder (!%p215_p2), %s657_s23, 7 }
   0x7   : > { %p253_p4 = scmp.lt.s32.totalorder (!%p215_p2), %s659_s24, 15  ;;  %s876_s12 = smov (!%p215_p2), 0  }
   0xb   : > { %v259_v0 = vld [vmem:[%s941_s2] sm:$0x1]  ;;  %v814_v5 = vld [vmem:[%s940_s1 + $0x2] sm:$0x3]  ;;  %s947_s23 = smov (!%p246_p3, %s657_s23), 7  ;;  %s949_s24 = smov (!%p253_p4, %s659_s24), 15 }
   0xc   : > { %v260_v1 = vld [vmem:[%s942_s3] sm:$0x1]  ;;  %v263_v2 = vmul.f32 0.0078125, %v259_v0  ;;  %v819_v6 = vld [vmem:[%s940_s1 + $0x4] sm:$0x3]  ;;  %s722_s17 = smul.u32 72, %s947_s23 }
   0xd   : > { %v264_v3 = vmul.f32 0.0078125, %v260_v1  ;;  %v809_v4 = vld [vmem:[%s940_s1] sm:$0x3]  ;;  %v824_v7 = vld [vmem:[%s940_s1 + $0x6] sm:$0x3]  ;;  %s660_s25 = sshll.u32 %s949_s24, 2 }
   0xe   : > { %v265_v8 = vmul.f32 %v263_v2, %v263_v2  ;;  %v829_v9 = vld [vmem:[%s940_s1 + $0x8] sm:$0x3]  ;;  %v834_v10 = vld [vmem:[%s940_s1 + $0xa] sm:$0x3]  ;;  %v839_v11 = vld [vmem:[%s940_s1 + $0xc] sm:$0x3]  ;;  %s854_s23 = scalar_lea.vmem %s939_s0, %s722_s17  ;;  %s859_s8 = scalar_lea.vmem %s945_s6, %s660_s25 }
   0xf   : > { %v844_v12 = vld [vmem:[%s940_s1 + $0xe] sm:$0x3]  ;;  %v849_v14 = vld [vmem:[%s940_s1 + $0x10] sm:$0x3]  ;;  %v261_v21 = vld [vmem:[%s943_s4] sm:$0x1] }
  0x10   : > { %v266_v13 = vsub.f32 %v264_v3, %v265_v8  ;;  %v869_v25 = vld [vmem:[%s944_s5] sm:$0x1] }
  0x12   : > { %v267_v15 = vadd.f32 1e-05, %v266_v13 }
  0x14   : > { %739 = vrsqrt.f32 %v267_v15  ;;  %vm274_vm0 = vweird.f32 %v267_v15 }
  0x1a   : > { %v740_v16 = vpop.eup %739 }
  0x1b   : > { %v269_v17 = vmul.f32 %v740_v16, %v267_v15  ;;  %vm275_vm1 = vweird.f32 %v740_v16 }
  0x1c   : > { %vm276_vm2 = vmor %vm274_vm0, %vm275_vm1 }
  0x1d   : > { %v270_v18 = vmul.f32 %v740_v16, %v269_v17 }
  0x1f   : > { %v271_v19 = vmul.f32 0.5, %v270_v18 }
  0x21   : > { %v272_v20 = vsub.f32 1.5, %v271_v19 }
  0x23   : > { %v273_v22 = vmul.f32 %v740_v16, %v272_v20 }
  0x25   : > { %v277_v23 = vsel %vm276_vm2, %v740_v16, %v273_v22 }
  0x26   : > { %v864_v24 = vmul.f32 %v277_v23, %v261_v21 }
  0x28   : > { %v872_v26 = vmul.f32 %v864_v24, %v263_v2 }
  0x2a   : > { %v280_v27 = vsub.f32 %v869_v25, %v872_v26 }
  0x2b LB: >> { %vm316_vm3 = vcmask 1041408   ;;  %s714_s13 = sshll.u32 %s755_s12, 3  ;;  %vm312_vm4 = vcmask 31744   ;;  %vm566_vm5 = vcmask 27648   ;;  %s303_s12 = sadd.s32 1, %s755_s12   ;;  %s755_s12 = sphi %s876_s12, %s303_s12  }
  0x2c   : >> { %v318_v28 = vsel %vm316_vm3, %v814_v5, 0  ;;  %v337_v29 = vsel %vm316_vm3, %v809_v4, 0  ;;  %v394_v30 = vsel %vm316_vm3, %v824_v7, 0  ;;  %v418_v31 = vsel %vm316_vm3, %v829_v9, 0  ;;  %s897_s14 = scalar_lea.vmem %s854_s23, %s714_s13  ;;  %s562_s15 = sshra.s32 %s714_s13, 3 }
  0x2d   : >> { %327 = vmatpush.bf16.msra.mxu0 %v318_v28  ;;  %346 = vmatpush.bf16.msra.mxu1 %v337_v29  ;;  %v370_v32 = vsel %vm316_vm3, %v819_v6, 0  ;;  %v501_v33 = vsel %vm316_vm3, %v844_v12, 0  ;;  %v477_v34 = vsel %vm316_vm3, %v839_v11, 0  ;;  %v452_v35 = vsel %vm316_vm3, %v834_v10, 0  ;;  %v673_v37 = vld [vmem:[%s897_s14 + $0x48] sm:$0xf] }
  0x2e   : >> { %403 = vmatpush.bf16.msra.mxu3 %v394_v30  ;;  %v535_v36 = vsel %vm316_vm3, %v849_v14, 0  ;;  %v307_v38 = vld [vmem:[%s897_s14] sm:$0xf]  ;;  %v683_v39 = vld [vmem:[%s897_s14 + $0x90] sm:$0xf]  ;;  %379 = vmatpush.bf16.msra.mxu2 %v370_v32  ;;  %s711_s16 = sshll.u32 %s562_s15, 2 }
  0x2f   : >> { %v678_v40 = vld [vmem:[%s897_s14] sm:$0xf]  ;;  %v716_v41 = vld [vmem:[%s897_s14] sm:$0x10]  ;;  %v693_v43 = vld [vmem:[%s897_s14 + $0x90] sm:$0xf]  ;;  %s565_s17 = scalar_lea.vmem %s859_s8, %s711_s16 }
  0x30   : >> { %674 = vmatmul.msk.bf16.vlgmr.msra.gmra.mxu0 %vm312_vm4, %v673_v37  ;;  %675 = vmatmul.msk.bf16.vlgmr.msra.gmra.mxu1 %vm312_vm4, %v307_v38  ;;  %v679_v42 = vor.u32 %v716_v41, %v678_v40  ;;  %v719_v44 = vld [vmem:[%s897_s14 + $0x90] sm:$0x10]  ;;  %v687_v54 = vld [vmem:[%s897_s14 + $0xd8] sm:$0xf]  ;;  %v707_v55 = vld [vmem:[%s897_s14 + $0x8] sm:$0xf] }
  0x31   : >> { %427 = vmatpush.bf16.msrb.mxu0 %v418_v31  ;;  %684 = vmatmul.msk.bf16.vlgmr.msra.gmra.mxu3 %vm312_vm4, %v683_v39  ;;  %v694_v45 = vor.u32 %v719_v44, %v693_v43  ;;  %v721_v56 = vld [vmem:[%s897_s14 + $0x8] sm:$0x10]  ;;  %v701_v57 = vld [vmem:[%s897_s14 + $0x50] sm:$0xf]  ;;  %v697_v60 = vld [vmem:[%s897_s14 + $0x8] sm:$0xf] }
  0x32   : >> { %510 = vmatpush.bf16.msrb.mxu3 %v501_v33  ;;  %486 = vmatpush.bf16.msrb.mxu2 %v477_v34  ;;  %v360_v46 = vshrl.u32 %v679_v42, 16  ;;  %v362_v47 = vshll.u32 %v679_v42, 16  ;;  %v708_v58 = vor.u32 %v721_v56, %v707_v55  ;;  %v556_v38 = vperm.slane %v280_v27, 0  ;;  %p300_p5 = scmp.ge.s32.totalorder %s303_s12, 8  }
  0x33   : >> { %461 = vmatpush.bf16.msrb.mxu1 %v452_v35  ;;  %v444_v48 = vshll.u32 %v694_v45, 16  ;;  %v442_v51 = vshrl.u32 %v694_v45, 16 }
  0x34   : >> { %v364_v49 = vrot.slane %v362_v47, 1  ;;  %v527_v59 = vshll.u32 %v708_v58, 16  ;;  %v525_v61 = vshrl.u32 %v708_v58, 16 }
  0x35   : >> { %544 = vmatpush.bf16.msra.mxu0 %v535_v36  ;;  %v446_v52 = vrot.slane %v444_v48, 1  ;;  %v552_v36 = vperm.slane %v864_v24, 0 }
  0x36   : >> { %v365_v50 = vor.u32 %v364_v49, %v360_v46  ;;  %v529_v62 = vrot.slane %v527_v59, 1 }
  0x37   : >> { %v447_v53 = vor.u32 %v446_v52, %v442_v51 }
  0x38   : >> { %680 = vmatmul.msk.bf16.vlgmr.msra.gmra.mxu2 %vm312_vm4, %v365_v50  ;;  %v530_v63 = vor.u32 %v529_v62, %v525_v61 }
  0x40   : >> { %688 = vmatmul.msk.bf16.vlgmr.msrb.gmra.mxu0 %vm312_vm4, %v687_v54  ;;  %695 = vmatmul.msk.bf16.vlgmr.msrb.gmra.mxu1 %vm312_vm4, %v447_v53 }
  0x41   : >> { %702 = vmatmul.msk.bf16.vlgmr.msrb.gmra.mxu3 %vm312_vm4, %v701_v57 }
  0x48   : >> { %698 = vmatmul.msk.bf16.vlgmr.msrb.gmra.mxu2 %vm312_vm4, %v697_v60 }
  0x50   : >> { %709 = vmatmul.msk.bf16.vlgmr.msra.gmra.mxu0 %vm312_vm4, %v530_v63 }
  0xad   : >> { %v329_v0 = vpop.f32.mrf.mxu0  ;;  %v348_v1 = vpop.f32.mrf.mxu1 }
  0xae   : >> { %v349_v16 = vadd.f32 %v348_v1, %v329_v0 }
  0xb4   : >> { %v405_v2 = vpop.f32.mrf.mxu3 }
  0xb5   : >> { %v331_v3 = vpop.f32.mrf.mxu0  ;;  %v350_v8 = vpop.f32.mrf.mxu1 }
  0xbb   : >> { %v381_v13 = vpop.f32.mrf.mxu2 }
  0xbc   : >> { %v407_v15 = vpop.f32.mrf.mxu3  ;;  %v385_v19 = vadd.f32 %v381_v13, %v349_v16 }
  0xbd   : >> { %v429_v17 = vpop.f32.mrf.mxu0  ;;  %v463_v18 = vpop.f32.mrf.mxu1 }
  0xbe   : >> { %v409_v20 = vadd.f32 %v405_v2, %v385_v19 }
  0xc0   : >> { %v433_v29 = vadd.f32 %v429_v17, %v409_v20 }
  0xc2   : >> { %v467_v30 = vadd.f32 %v463_v18, %v433_v29 }
  0xc3   : >> { %v383_v21 = vpop.f32.mrf.mxu2 }
  0xc4   : >> { %v512_v22 = vpop.f32.mrf.mxu3 }
  0xc5   : >> { %v431_v23 = vpop.f32.mrf.mxu0  ;;  %v465_v28 = vpop.f32.mrf.mxu1 }
  0xcb   : >> { %v488_v31 = vpop.f32.mrf.mxu2 }
  0xcc   : >> { %v514_v32 = vpop.f32.mrf.mxu3  ;;  %v492_v33 = vadd.f32 %v488_v31, %v467_v30 }
  0xcd   : >> { %v546_v34 = vpop.f32.mrf.mxu0 }
  0xce   : >> { %v516_v35 = vadd.f32 %v512_v22, %v492_v33 }
  0xd0   : >> { %v550_v37 = vadd.f32 %v546_v34, %v516_v35 }
  0xd2   : >> { %v554_v39 = vmul.f32 %v552_v36, %v550_v37 }
  0xd3   : >> { %v490_v40 = vpop.f32.mrf.mxu2 }
  0xd4   : >> { %v558_v41 = vadd.f32 %v556_v38, %v554_v39 }
  0xd5   : >> { %v548_v42 = vpop.f32.mrf.mxu0 }
  0xd6   : >> { %v559_v43 = vmax.f32 %v558_v41, 0.0  ;;  %302 = sbr.rel (!%p300_p5) target bundleno = 43 (0x2b), region = 96 }
  0xd8   : >> { %v561_v44 = vpack.c.bf16 %v559_v43, %v559_v43 }
  0xda   : >> { %567 = vst.msk [vmem:[%s565_s17] sm:$0xf] %vm566_vm5, %v561_v44 }
  0xdb PF: > { %s16_s21 = sadd.s32 1, %s751_s21  }
  0xdc   : > { %p13_p6 = scmp.ge.s32.totalorder %s16_s21, 4  }
  0xde   :  { %15 = sbr.rel (!%p13_p6) target bundleno = 1 (0x1), region = 107 }

// kernel: bottleneck_forward.8
= control target key start
LH: loop header
LB: loop body
LE: loop exit
PB: predicated region body
PF: predicated region fallthrough
CT: control target
= control target key end

     0   :  { %s682_s12 = smov 0   ;;  %s830_s0 = inlined_call_operand.vmem [shape: bf16[8,9,9,4], index: 0, kind: input, shape index: {}]   ;;  %s831_s1 = inlined_call_operand.vmem [shape: bf16[9,4,4], index: 1, kind: input, shape index: {}]   ;;  %s832_s2 = inlined_call_operand.vmem [shape: f32[1,4], index: 2, kind: output, shape index: {0}]   ;;  %s833_s3 = inlined_call_operand.vmem [shape: f32[1,4], index: 3, kind: output, shape index: {1}]  }
   0x1 LB: > { %s529_s13 = sadd.s32 4294967295, %s647_s12   ;;  %p532_p0 = scmp.ge.s32.totalorder %s647_s12, 1  ;;  %s647_s12 = sphi %s682_s12, %s14_s12  }
   0x2   : > { %p132_p1 = scmp.lt.s32.totalorder %s647_s12, 3 }
   0x4   : > { %p133_p2 = pnand %p532_p0, %p132_p1 }
   0x5   : > { %s533_s14 = sshll.u32 (!%p133_p2), %s529_s13, 2  ;;  %p535_p4 = scmp.ne.s32.totalorder (!%p133_p2), %s529_s13, 0 }
   0x6   : > { %136 = sbr.rel (%p133_p2) target bundleno = 210 (0xd2), region = 28  ;;  %p153_p3 = scmp.lt.s32.totalorder (!%p133_p2), %s533_s14, 7 }
   0xb   : > { %s837_s14 = smov (!%p153_p3, %s533_s14), 7  ;;  %163 = sbr.rel (%p535_p4) target bundleno = 19 (0x13), region = 32 }
   0xc   : > { %s595_s15 = smul.u32 72, %s837_s14 }
   0xe   : > { %s693_s18 = scalar_lea.vmem %s830_s0, %s595_s15 }
  0x10   : > { %vm164_vm0 = vcmask 24576   ;;  %v661_v0 = vmov 0.0  }
  0x11   : > { %165 = vst.msk [vmem:[%s832_s2] sm:$0x1] %vm164_vm0, %v661_v0 }
  0x12   : > { %166 = vst.msk [vmem:[%s833_s3] sm:$0x1] %vm164_vm0, %v661_v0 }
  0x13 PF: > { %v704_v1 = vld [vmem:[%s831_s1] sm:$0x3]  ;;  %v709_v2 = vld [vmem:[%s831_s1 + $0x2] sm:$0x3]  ;;  %v714_v3 = vld [vmem:[%s831_s1 + $0x4] sm:$0x3] }
  0x14   : > { %v719_v4 = vld [vmem:[%s831_s1 + $0x6] sm:$0x3]  ;;  %v724_v5 = vld [vmem:[%s831_s1 + $0x8] sm:$0x3]  ;;  %v729_v6 = vld [vmem:[%s831_s1 + $0xa] sm:$0x3] }
  0x15   : > { %v734_v7 = vld [vmem:[%s831_s1 + $0xc] sm:$0x3]  ;;  %v739_v8 = vld [vmem:[%s831_s1 + $0xe] sm:$0x3]  ;;  %v744_v9 = vld [vmem:[%s831_s1 + $0x10] sm:$0x3] }
  0x16   : > { %v746_v10 = vmov 0.0   ;;  %v748_v11 = vmov 0.0   ;;  %s750_s15 = smov 0  }
  0x17 LB: >> { %vm204_vm1 = vcmask 1041408   ;;  %s587_s16 = sshll.u32 %s659_s15, 3  ;;  %vm200_vm2 = vcmask 31744   ;;  %s189_s15 = sadd.s32 1, %s659_s15   ;;  %s659_s15 = sphi %s750_s15, %s189_s15   ;;  %v655_v11 = vphi %v748_v11, %v835_v11   ;;  %v651_v10 = vphi %v746_v10, %v834_v10  }
  0x18   : >> { %v206_v12 = vsel %vm204_vm1, %v709_v2, 0  ;;  %v225_v13 = vsel %vm204_vm1, %v704_v1, 0  ;;  %v282_v14 = vsel %vm204_vm1, %v719_v4, 0  ;;  %v306_v15 = vsel %vm204_vm1, %v724_v5, 0  ;;  %s775_s17 = scalar_lea.vmem %s693_s18, %s587_s16  ;;  %p186_p5 = scmp.ge.s32.totalorder %s189_s15, 8  }
  0x19   : >> { %215 = vmatpush.bf16.msra.mxu0 %v206_v12  ;;  %234 = vmatpush.bf16.msra.mxu1 %v225_v13  ;;  %v258_v16 = vsel %vm204_vm1, %v714_v3, 0  ;;  %v389_v17 = vsel %vm204_vm1, %v739_v8, 0  ;;  %v365_v18 = vsel %vm204_vm1, %v734_v7, 0  ;;  %v340_v19 = vsel %vm204_vm1, %v729_v6, 0  ;;  %v548_v21 = vld [vmem:[%s775_s17 + $0x48] sm:$0xf] }
  0x1a   : >> { %291 = vmatpush.bf16.msra.mxu3 %v282_v14  ;;  %v423_v20 = vsel %vm204_vm1, %v744_v9, 0  ;;  %v195_v22 = vld [vmem:[%s775_s17] sm:$0xf]  ;;  %v558_v23 = vld [vmem:[%s775_s17 + $0x90] sm:$0xf]  ;;  %267 = vmatpush.bf16.msra.mxu2 %v258_v16  ;;  %vm458_vm3 = vcmask (%p186_p5), 24576  }
  0x1b   : >> { %v553_v24 = vld [vmem:[%s775_s17] sm:$0xf]  ;;  %v589_v25 = vld [vmem:[%s775_s17] sm:$0x10]  ;;  %v568_v27 = vld [vmem:[%s775_s17 + $0x90] sm:$0xf] }
  0x1c   : >> { %549 = vmatmul.msk.bf16.vlgmr.msra.gmra.mxu0 %vm200_vm2, %v548_v21  ;;  %550 = vmatmul.msk.bf16.vlgmr.msra.gmra.mxu1 %vm200_vm2, %v195_v22  ;;  %v554_v26 = vor.u32 %v589_v25, %v553_v24  ;;  %v592_v28 = vld [vmem:[%s775_s17 + $0x90] sm:$0x10]  ;;  %v562_v38 = vld [vmem:[%s775_s17 + $0xd8] sm:$0xf]  ;;  %v582_v39 = vld [vmem:[%s775_s17 + $0x8] sm:$0xf] }
  0x1d   : >> { %315 = vmatpush.bf16.msrb.mxu0 %v306_v15  ;;  %559 = vmatmul.msk.bf16.vlgmr.msra.gmra.mxu3 %vm200_vm2, %v558_v23  ;;  %v569_v29 = vor.u32 %v592_v28, %v568_v27  ;;  %v594_v40 = vld [vmem:[%s775_s17 + $0x8] sm:$0x10]  ;;  %v576_v41 = vld [vmem:[%s775_s17 + $0x50] sm:$0xf]  ;;  %v572_v44 = vld [vmem:[%s775_s17 + $0x8] sm:$0xf] }
  0x1e   : >> { %398 = vmatpush.bf16.msrb.mxu3 %v389_v17  ;;  %374 = vmatpush.bf16.msrb.mxu2 %v365_v18  ;;  %v248_v30 = vshrl.u32 %v554_v26, 16  ;;  %v250_v31 = vshll.u32 %v554_v26, 16  ;;  %v583_v42 = vor.u32 %v594_v40, %v582_v39 }
  0x1f   : >> { %349 = vmatpush.bf16.msrb.mxu1 %v340_v19  ;;  %v332_v32 = vshll.u32 %v569_v29, 16  ;;  %v330_v35 = vshrl.u32 %v569_v29, 16 }
  0x20   : >> { %v252_v33 = vrot.slane %v250_v31, 1  ;;  %v415_v43 = vshll.u32 %v583_v42, 16  ;;  %v413_v45 = vshrl.u32 %v583_v42, 16 }
  0x21   : >> { %432 = vmatpush.bf16.msra.mxu0 %v423_v20  ;;  %v334_v36 = vrot.slane %v332_v32, 1 }
  0x22   : >> { %v253_v34 = vor.u32 %v252_v33, %v248_v30  ;;  %v417_v46 = vrot.slane %v415_v43, 1 }
  0x23   : >> { %v335_v37 = vor.u32 %v334_v36, %v330_v35 }
  0x24   : >> { %555 = vmatmul.msk.bf16.vlgmr.msra.gmra.mxu2 %vm200_vm2, %v253_v34  ;;  %v418_v47 = vor.u32 %v417_v46, %v413_v45 }
  0x2c   : >> { %563 = vmatmul.msk.bf16.vlgmr.msrb.gmra.mxu0 %vm200_vm2, %v562_v38  ;;  %570 = vmatmul.msk.bf16.vlgmr.msrb.gmra.mxu1 %vm200_vm2, %v335_v37  ;;  %v456_v38 = vld [vmem:[%s832_s2] sm:$0x1] (%p186_p5) }
  0x2d   : >> { %577 = vmatmul.msk.bf16.vlgmr.msrb.gmra.mxu3 %vm200_vm2, %v576_v41 }
  0x34   : >> { %573 = vmatmul.msk.bf16.vlgmr.msrb.gmra.mxu2 %vm200_vm2, %v572_v44 }
  0x3c   : >> { %584 = vmatmul.msk.bf16.vlgmr.msra.gmra.mxu0 %vm200_vm2, %v418_v47 }
  0x99   : >> { %v217_v48 = vpop.f32.mrf.mxu0  ;;  %v236_v49 = vpop.f32.mrf.mxu1 }
  0x9a   : >> { %v237_v55 = vadd.f32 %v236_v49, %v217_v48 }
  0xa0   : >> { %v293_v50 = vpop.f32.mrf.mxu3 }
  0xa1   : >> { %v219_v51 = vpop.f32.mrf.mxu0  ;;  %v238_v52 = vpop.f32.mrf.mxu1 }
  0xa7   : >> { %v269_v53 = vpop.f32.mrf.mxu2 }
  0xa8   : >> { %v295_v54 = vpop.f32.mrf.mxu3  ;;  %v273_v58 = vadd.f32 %v269_v53, %v237_v55 }
  0xa9   : >> { %v317_v56 = vpop.f32.mrf.mxu0  ;;  %v351_v57 = vpop.f32.mrf.mxu1 }
  0xaa   : >> { %v297_v59 = vadd.f32 %v293_v50, %v273_v58 }
  0xac   : >> { %v321_v0 = vadd.f32 %v317_v56, %v297_v59 }
  0xae   : >> { %v355_v12 = vadd.f32 %v351_v57, %v321_v0 }
  0xaf   : >> { %v271_v60 = vpop.f32.mrf.mxu2 }
  0xb0   : >> { %v400_v61 = vpop.f32.mrf.mxu3 }
  0xb1   : >> { %v319_v62 = vpop.f32.mrf.mxu0  ;;  %v353_v63 = vpop.f32.mrf.mxu1 }
  0xb7   : >> { %v376_v13 = vpop.f32.mrf.mxu2 }
  0xb8   : >> { %v402_v14 = vpop.f32.mrf.mxu3  ;;  %v380_v15 = vadd.f32 %v376_v13, %v355_v12 }
  0xb9   : >> { %v434_v16 = vpop.f32.mrf.mxu0 }
  0xba   : >> { %v404_v17 = vadd.f32 %v400_v61, %v380_v15 }
  0xbc   : >> { %v438_v18 = vadd.f32 %v434_v16, %v404_v17 }
  0xbe   : >> { %v439_v19 = vsel %vm200_vm2, %v438_v18, 0.0  ;;  %v447_v20 = vmul.f32 %v438_v18, %v438_v18 }
  0xbf   : >> { %v440_v21 = vrot.slane %v439_v19, 4  ;;  %v378_v22 = vpop.f32.mrf.mxu2 }
  0xc0   : >> { %v448_v23 = vsel %vm200_vm2, %v447_v20, 0.0 }
  0xc1   : >> { %v436_v24 = vpop.f32.mrf.mxu0  ;;  %v441_v25 = vadd.f32 %v440_v21, %v439_v19  ;;  %v449_v26 = vrot.slane %v448_v23, 4 }
  0xc3   : >> { %v442_v27 = vrot.slane %v441_v25, 2  ;;  %v450_v28 = vadd.f32 %v449_v26, %v448_v23 }
  0xc5   : >> { %v443_v29 = vadd.f32 %v442_v27, %v441_v25  ;;  %v451_v30 = vrot.slane %v450_v28, 2 }
  0xc7   : >> { %v444_v31 = vrot.slane %v443_v29, 1  ;;  %v452_v32 = vadd.f32 %v451_v30, %v450_v28 }
  0xc9   : >> { %v445_v33 = vadd.f32 %v444_v31, %v443_v29  ;;  %v453_v34 = vrot.slane %v452_v32, 1 }
  0xcb   : >> { %v446_v35 = vadd.f32 %v655_v11, %v445_v33   ;;  %v454_v36 = vadd.f32 %v453_v34, %v452_v32  ;;  %188 = sbr.rel (!%p186_p5) target bundleno = 23 (0x17), region = 87 }
  0xcd   : >> { %v455_v37 = vadd.f32 %v651_v10, %v454_v36   ;;  %v835_v11 = vmov %v446_v35  ;;  %v457_v39 = vadd.f32 (%p186_p5), %v456_v38, %v446_v35 }
  0xce   : > { %v460_v11 = vld [vmem:[%s833_s3] sm:$0x1] (%p186_p5) }
  0xcf   : >> { %v834_v10 = vmov %v455_v37  ;;  %v461_v40 = vadd.f32 (%p186_p5), %v460_v11, %v455_v37  ;;  %459 = vst.msk [vmem:[%s832_s2] sm:$0x1] (%p186_p5), %vm458_vm3, %v457_v39 }
  0xd1   : > { %462 = vst.msk [vmem:[%s833_s3] sm:$0x1] %vm458_vm3, %v461_v40 }
  0xd2 PF: > { %s14_s12 = sadd.s32 1, %s647_s12  }
  0xd3   : > { %p11_p6 = scmp.ge.s32.totalorder %s14_s12, 4  }
  0xd5   :  { %13 = sbr.rel (!%p11_p6) target bundleno = 1 (0x1), region = 98 }

// kernel: bottleneck_forward.11
= control target key start
LH: loop header
LB: loop body
LE: loop exit
PB: predicated region body
PF: predicated region fallthrough
CT: control target
= control target key end

     0   :  { %s1218_s0 = inlined_call_operand.vmem [shape: bf16[128,4], index: 0, kind: input, shape index: {}]   ;;  %s1219_s1 = inlined_call_operand.vmem [shape: bf16[128,4], index: 1, kind: input, shape index: {}]   ;;  %s1220_s2 = inlined_call_operand.vmem [shape: bf16[4,16], index: 2, kind: input, shape index: {}]   ;;  %s1221_s3 = inlined_call_operand.vmem [shape: bf16[4,16], index: 3, kind: input, shape index: {}]   ;;  %s1222_s4 = inlined_call_operand.vmem [shape: f32[1,16], index: 4, kind: input, shape index: {}]   ;;  %s1223_s5 = inlined_call_operand.vmem [shape: f32[1,16], index: 5, kind: input, shape index: {}]   ;;  %s1224_s6 = inlined_call_operand.vmem [shape: f32[1,16], index: 6, kind: input, shape index: {}]   ;;  %s1225_s7 = inlined_call_operand.vmem [shape: f32[1,16], index: 7, kind: input, shape index: {}]   ;;  %s1226_s8 = inlined_call_operand.vmem [shape: f32[1,16], index: 8, kind: input, shape index: {}]   ;;  %s1227_s9 = inlined_call_operand.vmem [shape: f32[1,16], index: 9, kind: input, shape index: {}]   ;;  %s1228_s10 = inlined_call_operand.vmem [shape: f32[1,16], index: 10, kind: input, shape index: {}]   ;;  %s1229_s11 = inlined_call_operand.vmem [shape: f32[1,16], index: 11, kind: input, shape index: {}]   ;;  %s1230_s12 = inlined_call_operand.hbm [shape: f32[128,16], index: 12, kind: output, shape index: {}]  }
   0x1   :  { %1231 = sst [smem:[#allocation5_spill]] %s1218_s0 }
   0x2   :  { %1232 = sst [smem:[#allocation6_spill]] %s1219_s1 }
   0x3   :  { %17 = vsyncpa [#allocation3], 0 }
   0x4   :  { %19 = vsyncpa [#allocation3 + $0x1], 0  ;;  %s1030_s21 = smov 0   ;;  %s1032_s22 = smov 0  }
   0x5   :  { %s1034_s23 = smov 0   ;;  %s1036_s24 = smov 0  }
   0x6 LB: > { %s1051_s25 = sadd.s32 4294967295, %s961_s24   ;;  %s789_s26 = sadd.s32 4294967294, %s961_s24   ;;  %s961_s24 = sphi %s1036_s24, %s1240_s24   ;;  %s957_s23 = sphi %s1034_s23, %s1239_s23   ;;  %s953_s22 = sphi %s1032_s22, %s1238_s22   ;;  %s949_s21 = sphi %s1030_s21, %s1237_s21  }
   0x7   : > { %s1055_s27 = sadd.s32 1, %s961_s24   ;;  %s294_s28 = sadd.s32 1, %s957_s23 }
   0x8   : > { %s291_s29 = ssub.s32 %s961_s24, %s1055_s27  ;;  %p304_p0 = scmp.ne.s32.totalorder %s957_s23, %s953_s22 }
   0x9   : > { %p292_p1 = scmp.eq.s32.totalorder %s291_s29, 0  ;;  %p305_p2 = scmp.eq.s32.totalorder %s1051_s25, 1 }
   0xa   : > { %p310_p3 = scmp.ne.s32.totalorder %s953_s22, %s949_s21  ;;  %p311_p4 = scmp.eq.s32.totalorder %s789_s26, 1 }
   0xb   : > { %s1066_s30 = scalar_select %p292_p1, %s957_s23, %s294_s28  }
   0xc   : > { %p1068_p5 = por %p305_p2, %p304_p0  ;;  %p1072_p6 = por %p311_p4, %p310_p3 }
   0xd   : > { %p792_p7 = scmp.ge.s32.totalorder %s961_s24, 1  ;;  %p377_p8 = scmp.lt.s32.totalorder %s961_s24, 3 }
   0xf   : > { %p378_p9 = pnand %p792_p7, %p377_p8 }
  0x10   : > { %s794_s19 = sshll.u32 (!%p378_p9), %s1051_s25, 3  ;;  %s1235_s0 = sld [smem:[#allocation5_spill]] (!%p378_p9) }
  0x11   : > { %381 = sbr.rel (%p378_p9) target bundleno = 196 (0xc4), region = 68  ;;  %p425_p10 = scmp.lt.s32.totalorder (!%p378_p9), %s794_s19, 15 }
  0x12   : > { %s1236_s1 = sld [smem:[#allocation6_spill]] (!%p378_p9)  ;;  %s421_s16 = sand.u32 (!%p378_p9), 1, %s953_s22  }
  0x13   : > { %s700_s15 = scalar_lea.sflag (!%p378_p9), [#allocation3], %s421_s16 }
  0x16   : > { %v446_v0 = vld [vmem:[%s1220_s2] sm:$0x3]  ;;  %vm480_vm0 = vcmask 1041408   ;;  %s1242_s19 = smov (!%p425_p10, %s794_s19), 15  ;;  %vm467_vm1 = vcmask 31744   ;;  %vm690_vm8 = vcmask 130048  }
  0x17   : > { %v521_v1 = vld [vmem:[%s1221_s3] sm:$0x3]  ;;  %v482_v2 = vsel %vm480_vm0, %v446_v0, 0  ;;  %s795_s20 = sshll.u32 %s1242_s19, 2  ;;  %s851_s19 = sshll.u32 %s1051_s25, 6 }
  0x18   : > { %v555_v3 = vsel %vm480_vm0, %v521_v1, 0  ;;  %491 = vmatpush.bf16.msra.mxu0 %v482_v2  ;;  %852 = vmatpush.bf16.msra.mxu2 %v482_v2  ;;  %s428_s29 = scalar_lea.vmem %s1235_s0, %s795_s20  ;;  %s434_s17 = scalar_lea.vmem %s1236_s1, %s795_s20  ;;  %v586_v12 = vld [vmem:[%s1222_s4] sm:$0x1] }
  0x19   : > { %564 = vmatpush.bf16.msra.mxu1 %v555_v3  ;;  %853 = vmatpush.bf16.msra.mxu3 %v555_v3  ;;  %v843_v4 = vld [vmem:[%s428_s29] sm:$0xff]  ;;  %v845_v5 = vld [vmem:[%s428_s29 + $0x10] sm:$0xff]  ;;  %v844_v8 = vld [vmem:[%s428_s29 + $0x8] sm:$0xff]  ;;  %v590_v14 = vmul.f32 0.0078125, %v586_v12  ;;  %s711_s28 = scalar_lea.hbm %s1230_s12, %s851_s19  ;;  %s919_s0 = scalar_lea.hbm %s1230_s12, 128 }
  0x1a   : > { %v847_v6 = vld [vmem:[%s434_s17] sm:$0xff]  ;;  %v849_v7 = vld [vmem:[%s434_s17 + $0x10] sm:$0xff]  ;;  %v846_v9 = vld [vmem:[%s428_s29 + $0x18] sm:$0xff]  ;;  %s714_s29 = sshll.u32 %s711_s28, 4  ;;  %s715_s29 = int_to_ptr.hbm [resolvable:$true] %s714_s29 }
  0x1b   : > { %814 = vmatmul.msk.bf16.vlgmr.msra.gmra.mxu0 %vm467_vm1, %v843_v4  ;;  %816 = vmatmul.msk.bf16.vlgmr.msra.gmra.mxu2 %vm467_vm1, %v845_v5  ;;  %v848_v10 = vld [vmem:[%s434_s17 + $0x8] sm:$0xff]  ;;  %v850_v11 = vld [vmem:[%s434_s17 + $0x18] sm:$0xff]  ;;  %v608_v13 = vld [vmem:[%s1224_s6] sm:$0x1]  ;;  %v592_v19 = vmul.f32 %v590_v14, %v590_v14  ;;  %s793_s17 = sshll.u32 %s421_s16, 6 }
  0x1c   : > { %834 = vmatmul.msk.bf16.vlgmr.msra.gmra.mxu1 %vm467_vm1, %v847_v6  ;;  %836 = vmatmul.msk.bf16.vlgmr.msra.gmra.mxu3 %vm467_vm1, %v849_v7  ;;  %v612_v15 = vmul.f32 0.0078125, %v608_v13  ;;  %v587_v16 = vld [vmem:[%s1223_s5] sm:$0x1]  ;;  %s1142_s18 = scalar_lea.vmem [#allocation2], %s793_s17  ;;  %s913_s17 = sshra.s32 %s715_s29, 4  ;;  %s914_s17 = int_to_ptr.hbm [resolvable:$true] %s913_s17 }
  0x1d   : > { %v609_v17 = vld [vmem:[%s1225_s7] sm:$0x1]  ;;  %v591_v18 = vmul.f32 0.0078125, %v587_v16  ;;  %s712_s25 = sshll.u32 %s1142_s18, 4  ;;  %s915_s19 = scalar_lea.hbm %s914_s17, 64  ;;  %s713_s25 = int_to_ptr.vmem [resolvable:$true] %s712_s25 }
  0x1e   : > { %v613_v20 = vmul.f32 0.0078125, %v609_v17  ;;  %v614_v21 = vmul.f32 %v612_v15, %v612_v15  ;;  %v588_v38 = vld [vmem:[%s1226_s8] sm:$0x1]  ;;  %p916_p11 = scmp.ne.s32.totalorder %s914_s17, %s915_s19  ;;  %p920_p0 = scmp.lt.s32.totalorder %s914_s17, %s1230_s12 }
  0x1f   : > { %v593_v22 = vsub.f32 %v591_v18, %v592_v19  ;;  %v610_v40 = vld [vmem:[%s1228_s10] sm:$0x1]  ;;  %p921_p1 = scmp.lt.s32.totalorder %s919_s0, %s915_s19 }
  0x20   : > { %v615_v23 = vsub.f32 %v613_v20, %v614_v21  ;;  %v589_v45 = vld [vmem:[%s1227_s9] sm:$0x1]  ;;  %p917_p12 = pnand %p916_p11, %p1068_p5 }
  0x21   : > { %v594_v24 = vadd.f32 1e-05, %v593_v22  ;;  %v611_v47 = vld [vmem:[%s1229_s11] sm:$0x1]  ;;  %p922_p2 = por %p921_p1, %p920_p0 }
  0x22   : > { %v616_v25 = vadd.f32 1e-05, %v615_v23  ;;  %p918_p13 = pneg %p917_p12 }
  0x23   : > { %895 = vrsqrt.f32 %v594_v24  ;;  %vm601_vm2 = vweird.f32 %v594_v24 }
  0x24   : > { %897 = vrsqrt.f32 %v616_v25  ;;  %vm623_vm4 = vweird.f32 %v616_v25  ;;  %p923_p3 = pnand %p922_p2, %p918_p13 }
  0x29   : > { %v896_v26 = vpop.eup %895 }
  0x2a   : > { %v898_v27 = vpop.eup %897  ;;  %v596_v28 = vmul.f32 %v896_v26, %v594_v24  ;;  %vm602_vm3 = vweird.f32 %v896_v26 }
  0x2b   : > { %815 = vmatmul.msk.bf16.gmra.mxu0 %vm467_vm1, %v844_v8  ;;  %817 = vmatmul.msk.bf16.gmra.mxu2 %vm467_vm1, %v846_v9  ;;  %v618_v29 = vmul.f32 %v898_v27, %v616_v25  ;;  %vm624_vm5 = vweird.f32 %v898_v27  ;;  %vm603_vm6 = vmor %vm601_vm2, %vm602_vm3 }
  0x2c   : > { %835 = vmatmul.msk.bf16.gmra.mxu1 %vm467_vm1, %v848_v10  ;;  %837 = vmatmul.msk.bf16.gmra.mxu3 %vm467_vm1, %v850_v11  ;;  %v597_v30 = vmul.f32 %v896_v26, %v596_v28  ;;  %vm625_vm7 = vmor %vm623_vm4, %vm624_vm5 }
  0x2d   : > { %v619_v31 = vmul.f32 %v898_v27, %v618_v29 }
  0x2e   : > { %v598_v32 = vmul.f32 0.5, %v597_v30 }
  0x2f   : > { %v620_v33 = vmul.f32 0.5, %v619_v31 }
  0x30   : > { %v599_v34 = vsub.f32 1.5, %v598_v32 }
  0x31   : > { %v621_v35 = vsub.f32 1.5, %v620_v33 }
  0x32   : > { %v600_v36 = vmul.f32 %v896_v26, %v599_v34 }
  0x33   : > { %v622_v37 = vmul.f32 %v898_v27, %v621_v35 }
  0x34   : > { %v604_v39 = vsel %vm603_vm6, %v896_v26, %v600_v36 }
  0x35   : > { %v626_v41 = vsel %vm625_vm7, %v898_v27, %v622_v37  ;;  %v605_v42 = vmul.f32 %v604_v39, %v588_v38 }
  0x36   : > { %v627_v43 = vmul.f32 %v626_v41, %v610_v40 }
  0x37   : > { %v606_v44 = vmul.f32 %v605_v42, %v590_v14  ;;  %v1123_v50 = vperm.slane %v605_v42, 0 }
  0x38   : > { %v628_v46 = vmul.f32 %v627_v43, %v612_v15  ;;  %v1125_v51 = vperm.slane %v627_v43, 0 }
  0x39   : > { %v607_v48 = vsub.f32 %v589_v45, %v606_v44 }
  0x3a   : > { %v629_v49 = vsub.f32 %v611_v47, %v628_v46 }
  0x3b   : > { %v1127_v52 = vperm.slane %v607_v48, 0 }
  0x3c   : > { %v1129_v54 = vperm.slane %v629_v49, 0 }
  0x98   : > { %v493_v53 = vpop.f32.mrf.mxu0 }
  0x99   : > { %v633_v55 = vmul.f32 %v1123_v50, %v493_v53  ;;  %v566_v56 = vpop.f32.mrf.mxu1 }
  0x9a   : > { %v655_v57 = vmul.f32 %v1125_v51, %v566_v56 }
  0x9b   : > { %v644_v58 = vadd.f32 %v1127_v52, %v633_v55 }
  0x9c   : > { %v666_v59 = vadd.f32 %v1129_v54, %v655_v57 }
  0x9e   : > { %v674_v60 = vadd.f32 %v666_v59, %v644_v58  ;;  %v503_v61 = vpop.f32.mrf.mxu2 }
  0x9f   : > { %v637_v62 = vmul.f32 %v1123_v50, %v503_v61  ;;  %v576_v63 = vpop.f32.mrf.mxu3 }
  0xa0   : > { %v682_v0 = vmax.f32 %v674_v60, 0.0  ;;  %v659_v1 = vmul.f32 %v1125_v51, %v576_v63  ;;  %v495_v2 = vpop.f32.mrf.mxu0 }
  0xa1   : > { %v648_v3 = vadd.f32 %v1127_v52, %v637_v62  ;;  %v634_v4 = vmul.f32 %v1123_v50, %v495_v2  ;;  %v568_v5 = vpop.f32.mrf.mxu1 }
  0xa2   : > { %691 = vst.msk [vmem:[%s1142_s18] sm:$0xff] %vm690_vm8, %v682_v0  ;;  %v670_v6 = vadd.f32 %v1129_v54, %v659_v1  ;;  %v656_v7 = vmul.f32 %v1125_v51, %v568_v5 }
  0xa3   : > { %v645_v8 = vadd.f32 %v1127_v52, %v634_v4 }
  0xa4   : > { %v678_v9 = vadd.f32 %v670_v6, %v648_v3  ;;  %v667_v10 = vadd.f32 %v1129_v54, %v656_v7 }
  0xa6   : > { %v686_v11 = vmax.f32 %v678_v9, 0.0  ;;  %v675_v12 = vadd.f32 %v667_v10, %v645_v8  ;;  %v505_v13 = vpop.f32.mrf.mxu2 }
  0xa7   : > { %v638_v14 = vmul.f32 %v1123_v50, %v505_v13  ;;  %v578_v15 = vpop.f32.mrf.mxu3 }
  0xa8   : > { %695 = vst.msk [vmem:[%s1142_s18 + $0x20] sm:$0xff] %vm690_vm8, %v686_v11  ;;  %v683_v16 = vmax.f32 %v675_v12, 0.0  ;;  %v660_v17 = vmul.f32 %v1125_v51, %v578_v15  ;;  %v498_v18 = vpop.f32.mrf.mxu0 }
  0xa9   : > { %v649_v19 = vadd.f32 %v1127_v52, %v638_v14  ;;  %v635_v20 = vmul.f32 %v1123_v50, %v498_v18  ;;  %v571_v21 = vpop.f32.mrf.mxu1 }
  0xaa   : > { %692 = vst.msk [vmem:[%s1142_s18 + $0x8] sm:$0xff] %vm690_vm8, %v683_v16  ;;  %v671_v22 = vadd.f32 %v1129_v54, %v660_v17  ;;  %v657_v23 = vmul.f32 %v1125_v51, %v571_v21 }
  0xab   : > { %v646_v24 = vadd.f32 %v1127_v52, %v635_v20 }
  0xac   : > { %v679_v25 = vadd.f32 %v671_v22, %v649_v19  ;;  %v668_v26 = vadd.f32 %v1129_v54, %v657_v23 }
  0xae   : > { %v687_v27 = vmax.f32 %v679_v25, 0.0  ;;  %v676_v28 = vadd.f32 %v668_v26, %v646_v24  ;;  %v508_v29 = vpop.f32.mrf.mxu2 }
  0xaf   : > { %v639_v30 = vmul.f32 %v1123_v50, %v508_v29  ;;  %v581_v31 = vpop.f32.mrf.mxu3 }
  0xb0   : > { %696 = vst.msk [vmem:[%s1142_s18 + $0x28] sm:$0xff] %vm690_vm8, %v687_v27  ;;  %v684_v32 = vmax.f32 %v676_v28, 0.0  ;;  %v661_v33 = vmul.f32 %v1125_v51, %v581_v31  ;;  %v500_v34 = vpop.f32.mrf.mxu0 }
  0xb1   : > { %v650_v35 = vadd.f32 %v1127_v52, %v639_v30  ;;  %v636_v36 = vmul.f32 %v1123_v50, %v500_v34  ;;  %v573_v37 = vpop.f32.mrf.mxu1 }
  0xb2   : > { %693 = vst.msk [vmem:[%s1142_s18 + $0x10] sm:$0xff] %vm690_vm8, %v684_v32  ;;  %v672_v38 = vadd.f32 %v1129_v54, %v661_v33  ;;  %v658_v39 = vmul.f32 %v1125_v51, %v573_v37 }
  0xb3   : > { %v647_v40 = vadd.f32 %v1127_v52, %v636_v36 }
  0xb4   : > { %v680_v41 = vadd.f32 %v672_v38, %v650_v35  ;;  %v669_v42 = vadd.f32 %v1129_v54, %v658_v39 }
  0xb6   : > { %v688_v43 = vmax.f32 %v680_v41, 0.0  ;;  %v677_v44 = vadd.f32 %v669_v42, %v647_v40  ;;  %v510_v45 = vpop.f32.mrf.mxu2 }
  0xb7   : > { %v640_v46 = vmul.f32 %v1123_v50, %v510_v45  ;;  %v583_v47 = vpop.f32.mrf.mxu3 }
  0xb8   : > { %697 = vst.msk [vmem:[%s1142_s18 + $0x30] sm:$0xff] %vm690_vm8, %v688_v43  ;;  %v685_v48 = vmax.f32 %v677_v44, 0.0  ;;  %v662_v49 = vmul.f32 %v1125_v51, %v583_v47 }
  0xb9   : > { %v651_v53 = vadd.f32 %v1127_v52, %v640_v46 }
  0xba   : > { %694 = vst.msk [vmem:[%s1142_s18 + $0x18] sm:$0xff] %vm690_vm8, %v685_v48  ;;  %v673_v55 = vadd.f32 %v1129_v54, %v662_v49 }
  0xbc   : > { %v681_v50 = vadd.f32 %v673_v55, %v651_v53 }
  0xbe   : > { %v689_v56 = vmax.f32 %v681_v50, 0.0 }
  0xc0   : > { %698 = vst.msk [vmem:[%s1142_s18 + $0x38] sm:$0xff] %vm690_vm8, %v689_v56 }
  0xc1   : > { %926 = shalt.err (!%p923_p3)
}
  0xc2   : > { %s963_s16 = smov 128   ;;  %s964_s18 = smov 8  }
  0xc3   : > { %854 = dma.vmem_to_hbm [thread:$0]  (%p1068_p5), %s713_s25, 1024, %s715_s29, %s700_s15, %s963_s16, %s963_s16, %s964_s18  }
  0xc4 PF: > { %p860_p4 = scmp.ge.s32.totalorder %s961_s24, 2  ;;  %s729_s20 = sand.u32 1, %s949_s21  }
  0xc5   : > { %s730_s1 = scalar_lea.sflag [#allocation3], %s729_s20 }
  0xc6   : > { %p857_p7 = pnand %p860_p4, %p1072_p6 }
  0xc8   : > { %p858_p8 = pneg %p857_p7 }
  0xca   : > { %944 = dma.done.wait (%p858_p8), %s730_s1, 1024  }
  0xcb   : > { %946 = vsyncadd (%p858_p8), %s730_s1, 4294966272  ;;  %p22_p9 = scmp.ge.s32.totalorder %s1055_s27, 4   ;;  %s1237_s21 = smov %s953_s22 }
  0xcc   : > { %s1238_s22 = smov %s957_s23  ;;  %s1239_s23 = smov %s1066_s30 }
  0xcd   : > { %s1240_s24 = smov %s1055_s27  ;;  %24 = sbr.rel (!%p22_p9) target bundleno = 6 (0x6), region = 106 }
  0xd2   :  { %736 = vsyncpa [#allocation3], 1 }
  0xd3   :  { %738 = vsyncpa [#allocation3 + $0x1], 1 }

// kernel: bottleneck_forward.10
= control target key start
LH: loop header
LB: loop body
LE: loop exit
PB: predicated region body
PF: predicated region fallthrough
CT: control target
= control target key end

     0   :  { %s729_s24 = smov 0   ;;  %s834_s0 = inlined_call_operand.vmem [shape: bf16[128,4], index: 0, kind: input, shape index: {}]   ;;  %s835_s1 = inlined_call_operand.vmem [shape: bf16[128,4], index: 1, kind: input, shape index: {}]   ;;  %s836_s2 = inlined_call_operand.vmem [shape: bf16[4,16], index: 2, kind: input, shape index: {}]   ;;  %s837_s3 = inlined_call_operand.vmem [shape: bf16[4,16], index: 3, kind: input, shape index: {}]   ;;  %s838_s4 = inlined_call_operand.vmem [shape: f32[1,16], index: 4, kind: output, shape index: {0}]   ;;  %s839_s5 = inlined_call_operand.vmem [shape: f32[1,16], index: 5, kind: output, shape index: {1}]   ;;  %s840_s6 = inlined_call_operand.vmem [shape: f32[1,16], index: 6, kind: output, shape index: {2}]   ;;  %s841_s7 = inlined_call_operand.vmem [shape: f32[1,16], index: 7, kind: output, shape index: {3}]  }
   0x1 LB: > { %s610_s25 = sadd.s32 4294967295, %s686_s24   ;;  %p613_p0 = scmp.ge.s32.totalorder %s686_s24, 1  ;;  %s686_s24 = sphi %s729_s24, %s18_s24  }
   0x2   : > { %p236_p1 = scmp.lt.s32.totalorder %s686_s24, 3 }
   0x4   : > { %p237_p2 = pnand %p613_p0, %p236_p1 }
   0x5   : > { %s614_s26 = sshll.u32 (!%p237_p2), %s610_s25, 3  ;;  %p618_p4 = scmp.ne.s32.totalorder (!%p237_p2), %s610_s25, 0 }
   0x6   : > { %240 = sbr.rel (%p237_p2) target bundleno = 205 (0xcd), region = 36  ;;  %p269_p3 = scmp.lt.s32.totalorder (!%p237_p2), %s614_s26, 15 }
   0xb   : > { %s843_s26 = smov (!%p269_p3, %s614_s26), 15  ;;  %284 = sbr.rel (%p618_p4) target bundleno = 21 (0x15), region = 40 }
   0xc   : > { %s615_s27 = sshll.u32 %s843_s26, 2 }
   0xd   : > { %s272_s30 = scalar_lea.vmem %s834_s0, %s615_s27  ;;  %s743_s10 = scalar_lea.vmem %s835_s1, %s615_s27 }
  0x10   : > { %vm285_vm0 = vcmask 122880   ;;  %v688_v0 = vmov 0.0  }
  0x11   : > { %286 = vst.msk [vmem:[%s838_s4] sm:$0x1] %vm285_vm0, %v688_v0 }
  0x12   : > { %287 = vst.msk [vmem:[%s839_s5] sm:$0x1] %vm285_vm0, %v688_v0 }
  0x13   : > { %288 = vst.msk [vmem:[%s840_s6] sm:$0x1] %vm285_vm0, %v688_v0 }
  0x14   : > { %289 = vst.msk [vmem:[%s841_s7] sm:$0x1] %vm285_vm0, %v688_v0 }
  0x15 PF: > { %v298_v1 = vld [vmem:[%s836_s2] sm:$0x3]  ;;  %vm332_vm1 = vcmask 1041408   ;;  %v663_v6 = vld [vmem:[%s272_s30 + $0x10] sm:$0xff]  ;;  %vm319_vm2 = vcmask 31744   ;;  %v662_v9 = vld [vmem:[%s272_s30 + $0x8] sm:$0xff] }
  0x16   : > { %v373_v2 = vld [vmem:[%s837_s3] sm:$0x3]  ;;  %v334_v3 = vsel %vm332_vm1, %v298_v1, 0  ;;  %v667_v8 = vld [vmem:[%s743_s10 + $0x10] sm:$0xff]  ;;  %v664_v10 = vld [vmem:[%s272_s30 + $0x18] sm:$0xff]  ;;  %vm439_vm3 = vcmask 130048  }
  0x17   : > { %v407_v4 = vsel %vm332_vm1, %v373_v2, 0  ;;  %v661_v5 = vld [vmem:[%s272_s30] sm:$0xff]  ;;  %343 = vmatpush.bf16.msra.mxu0 %v334_v3  ;;  %669 = vmatpush.bf16.msra.mxu2 %v334_v3  ;;  %v666_v11 = vld [vmem:[%s743_s10 + $0x8] sm:$0xff]  ;;  %v668_v12 = vld [vmem:[%s743_s10 + $0x18] sm:$0xff]  ;;  %vm462_vm4 = vcmask 122880  }
  0x18   : > { %v665_v7 = vld [vmem:[%s743_s10] sm:$0xff]  ;;  %416 = vmatpush.bf16.msra.mxu1 %v407_v4  ;;  %670 = vmatpush.bf16.msra.mxu3 %v407_v4 }
  0x1a   : > { %635 = vmatmul.msk.bf16.vlgmr.msra.gmra.mxu0 %vm319_vm2, %v661_v5  ;;  %637 = vmatmul.msk.bf16.vlgmr.msra.gmra.mxu2 %vm319_vm2, %v663_v6 }
  0x1b   : > { %655 = vmatmul.msk.bf16.vlgmr.msra.gmra.mxu1 %vm319_vm2, %v665_v7  ;;  %657 = vmatmul.msk.bf16.vlgmr.msra.gmra.mxu3 %vm319_vm2, %v667_v8 }
  0x2a   : > { %636 = vmatmul.msk.bf16.gmra.mxu0 %vm319_vm2, %v662_v9  ;;  %638 = vmatmul.msk.bf16.gmra.mxu2 %vm319_vm2, %v664_v10 }
  0x2b   : > { %656 = vmatmul.msk.bf16.gmra.mxu1 %vm319_vm2, %v666_v11  ;;  %658 = vmatmul.msk.bf16.gmra.mxu3 %vm319_vm2, %v668_v12 }
  0x97   : > { %v345_v13 = vpop.f32.mrf.mxu0 }
  0x98   : > { %v418_v14 = vpop.f32.mrf.mxu1  ;;  %v465_v21 = vmul.f32 %v345_v13, %v345_v13  ;;  %v440_v27 = vsel %vm439_vm3, %v345_v13, 0.0 }
  0x99   : > { %v521_v24 = vmul.f32 %v418_v14, %v418_v14  ;;  %v497_v29 = vsel %vm439_vm3, %v418_v14, 0.0 }
  0x9a   : > { %v473_v33 = vsel %vm439_vm3, %v465_v21, 0.0 }
  0x9b   : > { %v529_v37 = vsel %vm439_vm3, %v521_v24, 0.0 }
  0x9d   : > { %v355_v15 = vpop.f32.mrf.mxu2 }
  0x9e   : > { %v428_v16 = vpop.f32.mrf.mxu3  ;;  %v469_v28 = vmul.f32 %v355_v15, %v355_v15  ;;  %v447_v38 = vsel %vm439_vm3, %v355_v15, 0.0 }
  0x9f   : > { %v347_v17 = vpop.f32.mrf.mxu0  ;;  %v525_v30 = vmul.f32 %v428_v16, %v428_v16  ;;  %v504_v42 = vsel %vm439_vm3, %v428_v16, 0.0 }
  0xa0   : > { %v420_v18 = vpop.f32.mrf.mxu1  ;;  %v466_v22 = vmul.f32 %v347_v17, %v347_v17  ;;  %v441_v31 = vsel %vm439_vm3, %v347_v17, 0.0  ;;  %v480_v41 = vsel %vm439_vm3, %v469_v28, 0.0 }
  0xa1   : > { %v522_v25 = vmul.f32 %v420_v18, %v420_v18  ;;  %v498_v35 = vsel %vm439_vm3, %v420_v18, 0.0  ;;  %v442_v43 = vadd.f32 %v441_v31, %v440_v27  ;;  %v536_v46 = vsel %vm439_vm3, %v525_v30, 0.0 }
  0xa2   : > { %v474_v34 = vsel %vm439_vm3, %v466_v22, 0.0  ;;  %v499_v48 = vadd.f32 %v498_v35, %v497_v29 }
  0xa3   : > { %v530_v39 = vsel %vm439_vm3, %v522_v25, 0.0  ;;  %v475_v47 = vadd.f32 %v474_v34, %v473_v33 }
  0xa4   : > { %v531_v51 = vadd.f32 %v530_v39, %v529_v37 }
  0xa5   : > { %v357_v19 = vpop.f32.mrf.mxu2 }
  0xa6   : > { %v430_v20 = vpop.f32.mrf.mxu3  ;;  %v470_v52 = vmul.f32 %v357_v19, %v357_v19  ;;  %v449_v1 = vsel %vm439_vm3, %v357_v19, 0.0 }
  0xa7   : > { %v350_v23 = vpop.f32.mrf.mxu0  ;;  %v526_v56 = vmul.f32 %v430_v20, %v430_v20  ;;  %v506_v5 = vsel %vm439_vm3, %v430_v20, 0.0 }
  0xa8   : > { %v423_v26 = vpop.f32.mrf.mxu1  ;;  %v467_v32 = vmul.f32 %v350_v23, %v350_v23  ;;  %v443_v40 = vsel %vm439_vm3, %v350_v23, 0.0  ;;  %v482_v9 = vsel %vm439_vm3, %v470_v52, 0.0 }
  0xa9   : > { %v523_v36 = vmul.f32 %v423_v26, %v423_v26  ;;  %v500_v44 = vsel %vm439_vm3, %v423_v26, 0.0  ;;  %v444_v53 = vadd.f32 %v443_v40, %v442_v43  ;;  %v538_v13 = vsel %vm439_vm3, %v526_v56, 0.0 }
  0xaa   : > { %v476_v49 = vsel %vm439_vm3, %v467_v32, 0.0  ;;  %v501_v57 = vadd.f32 %v500_v44, %v499_v48 }
  0xab   : > { %v532_v54 = vsel %vm439_vm3, %v523_v36, 0.0  ;;  %v477_v61 = vadd.f32 %v476_v49, %v475_v47 }
  0xac   : > { %v533_v2 = vadd.f32 %v532_v54, %v531_v51 }
  0xad   : > { %v360_v45 = vpop.f32.mrf.mxu2 }
  0xae   : > { %v433_v50 = vpop.f32.mrf.mxu3  ;;  %v471_v10 = vmul.f32 %v360_v45, %v360_v45  ;;  %v451_v18 = vsel %vm439_vm3, %v360_v45, 0.0 }
  0xaf   : > { %v352_v55 = vpop.f32.mrf.mxu0  ;;  %v527_v14 = vmul.f32 %v433_v50, %v433_v50  ;;  %v508_v23 = vsel %vm439_vm3, %v433_v50, 0.0 }
  0xb0   : > { %v445_v58 = vsel %vm439_vm3, %v352_v55, 0.0  ;;  %v468_v59 = vmul.f32 %v352_v55, %v352_v55  ;;  %v425_v60 = vpop.f32.mrf.mxu1  ;;  %v484_v27 = vsel %vm439_vm3, %v471_v10, 0.0 }
  0xb1   : > { %v446_v62 = vadd.f32 %v445_v58, %v444_v53  ;;  %v502_v63 = vsel %vm439_vm3, %v425_v60, 0.0  ;;  %v524_v0 = vmul.f32 %v425_v60, %v425_v60  ;;  %v540_v31 = vsel %vm439_vm3, %v527_v14, 0.0 }
  0xb2   : > { %v478_v3 = vsel %vm439_vm3, %v468_v59, 0.0  ;;  %v503_v4 = vadd.f32 %v502_v63, %v501_v57  ;;  %v438_v57 = vld [vmem:[%s838_s4] sm:$0x1] }
  0xb3   : > { %v448_v6 = vadd.f32 %v447_v38, %v446_v62  ;;  %v479_v7 = vadd.f32 %v478_v3, %v477_v61  ;;  %v534_v8 = vsel %vm439_vm3, %v524_v0, 0.0  ;;  %v496_v62 = vld [vmem:[%s840_s6] sm:$0x1] }
  0xb4   : > { %v505_v11 = vadd.f32 %v504_v42, %v503_v4  ;;  %v535_v12 = vadd.f32 %v534_v8, %v533_v2  ;;  %v464_v63 = vld [vmem:[%s839_s5] sm:$0x1] }
  0xb5   : > { %v481_v15 = vadd.f32 %v480_v41, %v479_v7  ;;  %v362_v16 = vpop.f32.mrf.mxu2  ;;  %v450_v17 = vadd.f32 %v449_v1, %v448_v6  ;;  %v520_v4 = vld [vmem:[%s841_s7] sm:$0x1] }
  0xb6   : > { %v537_v19 = vadd.f32 %v536_v46, %v535_v12  ;;  %v472_v21 = vmul.f32 %v362_v16, %v362_v16  ;;  %v435_v20 = vpop.f32.mrf.mxu3  ;;  %v507_v22 = vadd.f32 %v506_v5, %v505_v11  ;;  %v453_v28 = vsel %vm439_vm3, %v362_v16, 0.0 }
  0xb7   : > { %v452_v24 = vadd.f32 %v451_v18, %v450_v17  ;;  %v483_v25 = vadd.f32 %v482_v9, %v481_v15  ;;  %v528_v26 = vmul.f32 %v435_v20, %v435_v20  ;;  %v510_v34 = vsel %vm439_vm3, %v435_v20, 0.0 }
  0xb8   : > { %v509_v29 = vadd.f32 %v508_v23, %v507_v22  ;;  %v539_v30 = vadd.f32 %v538_v13, %v537_v19  ;;  %v486_v35 = vsel %vm439_vm3, %v472_v21, 0.0 }
  0xb9   : > { %v454_v32 = vadd.f32 %v453_v28, %v452_v24  ;;  %v485_v33 = vadd.f32 %v484_v27, %v483_v25  ;;  %v542_v40 = vsel %vm439_vm3, %v528_v26, 0.0 }
  0xba   : > { %v511_v36 = vadd.f32 %v510_v34, %v509_v29  ;;  %v541_v37 = vadd.f32 %v540_v31, %v539_v30 }
  0xbb   : > { %v455_v38 = vrot.slane %v454_v32, 4  ;;  %v487_v39 = vadd.f32 %v486_v35, %v485_v33 }
  0xbc   : > { %v512_v41 = vrot.slane %v511_v36, 4  ;;  %v543_v42 = vadd.f32 %v542_v40, %v541_v37 }
  0xbd   : > { %v456_v43 = vadd.f32 %v455_v38, %v454_v32  ;;  %v488_v44 = vrot.slane %v487_v39, 4 }
  0xbe   : > { %v513_v45 = vadd.f32 %v512_v41, %v511_v36  ;;  %v544_v46 = vrot.slane %v543_v42, 4 }
  0xbf   : > { %v457_v47 = vrot.slane %v456_v43, 2  ;;  %v489_v48 = vadd.f32 %v488_v44, %v487_v39 }
  0xc0   : > { %v514_v49 = vrot.slane %v513_v45, 2  ;;  %v545_v50 = vadd.f32 %v544_v46, %v543_v42 }
  0xc1   : > { %v458_v51 = vadd.f32 %v457_v47, %v456_v43  ;;  %v490_v52 = vrot.slane %v489_v48, 2 }
  0xc2   : > { %v515_v53 = vadd.f32 %v514_v49, %v513_v45  ;;  %v546_v54 = vrot.slane %v545_v50, 2 }
  0xc3   : > { %v459_v55 = vrot.slane %v458_v51, 1  ;;  %v491_v56 = vadd.f32 %v490_v52, %v489_v48 }
  0xc4   : > { %v516_v58 = vrot.slane %v515_v53, 1  ;;  %v547_v59 = vadd.f32 %v546_v54, %v545_v50 }
  0xc5   : > { %v460_v60 = vadd.f32 %v459_v55, %v458_v51  ;;  %v492_v61 = vrot.slane %v491_v56, 1 }
  0xc6   : > { %v517_v0 = vadd.f32 %v516_v58, %v515_v53  ;;  %v548_v1 = vrot.slane %v547_v59, 1 }
  0xc7   : > { %v461_v2 = vadd.f32 %v460_v60, %v438_v57  ;;  %v493_v3 = vadd.f32 %v492_v61, %v491_v56 }
  0xc8   : > { %v518_v5 = vadd.f32 %v517_v0, %v496_v62  ;;  %v549_v6 = vadd.f32 %v548_v1, %v547_v59 }
  0xc9   : > { %463 = vst.msk [vmem:[%s838_s4] sm:$0x1] %vm462_vm4, %v461_v2  ;;  %v494_v7 = vadd.f32 %v493_v3, %v464_v63 }
  0xca   : > { %519 = vst.msk [vmem:[%s840_s6] sm:$0x1] %vm462_vm4, %v518_v5  ;;  %v550_v8 = vadd.f32 %v549_v6, %v520_v4 }
  0xcb   : > { %495 = vst.msk [vmem:[%s839_s5] sm:$0x1] %vm462_vm4, %v494_v7 }
  0xcc   : > { %551 = vst.msk [vmem:[%s841_s7] sm:$0x1] %vm462_vm4, %v550_v8 }
  0xcd PF: > { %s18_s24 = sadd.s32 1, %s686_s24  }
  0xce   : > { %p15_p5 = scmp.ge.s32.totalorder %s18_s24, 4  }
  0xd0   :  { %17 = sbr.rel (!%p15_p5) target bundleno = 1 (0x1), region = 93 }

</bundles_post_ra>
